<compile_context>
chip_gen: v7x
topology: tpu7x:2x2x1
jax: 0.10.0
libtpu: 0.0.40
codegen_flags: <defaults>
</compile_context>

<pallas_src>
import functools

import jax
import jax.numpy as jnp
from jax.experimental import pallas as pl
from jax.experimental.pallas import tpu as pltpu

# ----------------------------------------------------------------------------
# Model dimensions (scaled-down EfficientNet-style backbone) and padding.
# ----------------------------------------------------------------------------
C_IN, C_STEM, C_EXP, C_SE = 3, 8, 32, 8
CP = 128        # every channel dim zero-padded to 128 lanes (lane-dense)
KCOL = 128      # lane-dense im2col contraction depth for the stem (9*C_IN<=128)

# weight-bank / bias-bank row indices
W_EXP, W_SE1, W_SE2, W_PROJ, W_HEAD, W_FC = range(6)
B_STEM, B_EXP, B_SE1, B_SE2, B_PROJ, B_HEAD, B_FC, B_DW = range(8)


def _swish(x):
    return x * jax.nn.sigmoid(x)


# ----------------------------------------------------------------------------
# Fused forward kernel: one grid step == B images, everything VMEM-resident.
# ----------------------------------------------------------------------------
def _pollen_fused_kernel(xcol_ref, stemw_ref, dww_ref, w_ref, b_ref, o_ref,
                         res_ref, dwbuf, *, B, HO, WO):
    f32, bf16 = jnp.float32, jnp.bfloat16
    HW = HO * WO
    M = B * HW

    # --- stem: conv3x3 stride2 pad1 (+folded BN) as ONE K=128 MXU matmul over
    # the pre-built lane-dense bf16 im2col slab.
    xcol = xcol_ref[...].reshape(M, KCOL)                        # bf16
    x = _swish(jnp.dot(xcol, stemw_ref[...], preferred_element_type=f32)
               + b_ref[B_STEM:B_STEM + 1, :])                    # (M, CP) f32
    res_ref[...] = x          # stash residual in VMEM -> frees ~16 vregs

    # --- MBConv expand 1x1 + folded BN + swish (bf16 MXU, f32 accumulate).
    h = _swish(jnp.dot(x.astype(bf16), w_ref[W_EXP],
                       preferred_element_type=f32)
               + b_ref[B_EXP:B_EXP + 1, :])                      # (M, CP)

    # --- depthwise 3x3 (+folded BN scale) + bias + swish.
    # H halo via a sublane-aligned VMEM buffer: interior store and the 3
    # H-shifted reads are all whole-vreg, unmasked; only the two halo rows per
    # image are zeroed each step.  W taps are single-tile XLU sublane rolls
    # plus a 1-vreg column mask (no misaligned or masked VMEM stores).
    dwbuf[:, 1:HO + 1, :, :] = h.reshape(B, HO, WO, CP)
    zrow = jnp.zeros((B, 1, WO, CP), f32)
    dwbuf[:, 0:1, :, :] = zrow
    dwbuf[:, HO + 1:HO + 2, :, :] = zrow

    wo_ids = jax.lax.broadcasted_iota(jnp.int32, (WO, CP), 0)
    not_lft = (wo_ids > 0).astype(f32)            # dest col wo-1 is in range
    not_rgt = (wo_ids < WO - 1).astype(f32)       # dest col wo+1 is in range

    dww = dww_ref[...]                            # (16, CP) hoisted once
    dacc = jnp.zeros((B * HO, WO, CP), f32)
    for kh in range(3):
        rows = dwbuf[:, kh:kh + HO, :, :].reshape(B * HO, WO, CP)
        for kw in range(3):
            t = kh * 3 + kw
            w_row = dww[t:t + 1, :].reshape(1, 1, CP)
            if kw == 0:      # reads wo-1: roll down one sublane, mask wo==0
                tap = pltpu.roll(rows, shift=1, axis=1) * not_lft
            elif kw == 2:    # reads wo+1: roll up one sublane, mask wo==WO-1
                tap = pltpu.roll(rows, shift=WO - 1, axis=1) * not_rgt
            else:
                tap = rows
            dacc = dacc + tap * w_row
    h = _swish(dacc.reshape(M, CP) + b_ref[B_DW:B_DW + 1, :])    # (M, CP)

    # --- squeeze-excite: per-image GAP -> two M=B matmuls -> channel scale.
    h3 = h.reshape(B, HW, CP)
    pooled = jnp.mean(h3, axis=1)                                # (B, CP)
    se = _swish(jnp.dot(pooled.astype(bf16), w_ref[W_SE1],
                        preferred_element_type=f32)
                + b_ref[B_SE1:B_SE1 + 1, :])
    se = jax.nn.sigmoid(jnp.dot(se.astype(bf16), w_ref[W_SE2],
                                preferred_element_type=f32)
                        + b_ref[B_SE2:B_SE2 + 1, :])             # (B, CP)
    h = (h3 * se.reshape(B, 1, CP)).reshape(M, CP)

    # --- project 1x1 + folded BN; residual add fused into the epilogue.
    x = (jnp.dot(h.astype(bf16), w_ref[W_PROJ], preferred_element_type=f32)
         + b_ref[B_PROJ:B_PROJ + 1, :] + res_ref[...])

    # --- head 1x1 + folded BN + swish, then per-image global average pool.
    feat = _swish(jnp.dot(x.astype(bf16), w_ref[W_HEAD],
                          preferred_element_type=f32)
                  + b_ref[B_HEAD:B_HEAD + 1, :])
    feat = jnp.mean(feat.reshape(B, HW, CP), axis=1)             # (B, CP)

    # --- replaced classifier _fc: Linear(num_features, num_classes).
    logits = (jnp.dot(feat.astype(bf16), w_ref[W_FC],
                      preferred_element_type=f32)
              + b_ref[B_FC:B_FC + 1, :])                         # (B, CP)

    # Lane-dense (8, 128) output tile; only the B real logit rows are written.
    o_ref[0:1, 0:B, :] = logits.reshape(1, B, CP)


def _pick_batch_block(N):
    # B*HW per MXU pass: prefer 512/256/128 rows (HW=64).  For real
    # EfficientNet resolutions add a spatial grid axis + GAP accumulator and
    # set vmem_limit_bytes (v7x has only 64 MiB physical VMEM).
    for b in (8, 4, 2):
        if N % b == 0:
            return b
    return 1


def _pollen_pallas(xcol, stem_w, dw_w, w_bank, b_bank, *, B, HO, WO):
    N = xcol.shape[0]
    G = N // B
    HW = HO * WO
    kernel = functools.partial(_pollen_fused_kernel, B=B, HO=HO, WO=WO)
    return pl.pallas_call(
        kernel,
        out_shape=jax.ShapeDtypeStruct((G, 8, CP), jnp.float32),
        grid=(G,),
        in_specs=[
            pl.BlockSpec((B, HW, KCOL), lambda g: (g, 0, 0)),    # im2col slab
            pl.BlockSpec((KCOL, CP), lambda g: (0, 0)),          # stem weight
            pl.BlockSpec((16, CP), lambda g: (0, 0)),            # dw tap bank
            pl.BlockSpec((6, CP, CP), lambda g: (0, 0, 0)),      # 1x1/FC bank
            pl.BlockSpec((8, CP), lambda g: (0, 0)),             # bias bank
        ],
        out_specs=pl.BlockSpec((1, 8, CP), lambda g: (g, 0, 0)),
        scratch_shapes=[
            pltpu.VMEM((B * HW, CP), jnp.float32),               # residual stash
            pltpu.VMEM((B, HO + 2, WO, CP), jnp.float32),        # dw H-halo buf
        ],
        compiler_params=pltpu.CompilerParams(
            dimension_semantics=("parallel",)),
    )(xcol, stem_w, dw_w, w_bank, b_bank)


# ----------------------------------------------------------------------------
# Deterministic parameter init (BatchNorm folded, eval mode), lane-padded.
# ----------------------------------------------------------------------------
def init_params(key, num_classes, num_features):
    assert num_classes <= CP and num_features <= CP
    ks = jax.random.split(key, 16)

    def norm(k, shape, s=0.1):
        return s * jax.random.normal(k, shape, jnp.float32)

    def bn_fold(k, c, eps=1e-3):
        k1, k2, k3, k4 = jax.random.split(k, 4)
        gamma = 1.0 + norm(k1, (c,))
        beta = norm(k2, (c,))
        mean = norm(k3, (c,))
        var = 1.0 + jnp.abs(norm(k4, (c,)))
        scale = gamma / jnp.sqrt(var + eps)
        return scale, beta - mean * scale

    def pad_w(w):                       # (k_in, k_out) -> (CP, CP), zero pad
        ki, ko = w.shape
        return jnp.zeros((CP, CP), jnp.float32).at[:ki, :ko].set(w)

    def pad_b(b):
        return jnp.zeros((CP,), jnp.float32).at[:b.shape[0]].set(b)

    # stem conv 3x3 s2: torch (C_out, C_in, 3, 3); BN scale folded; laid out
    # tap-major ((kh*3+kw)*C_IN + ci) to match the wrapper's im2col slab, K
    # padded to 128 so the stem is a single lane-dense MXU matmul.
    w = norm(ks[0], (C_STEM, C_IN, 3, 3))
    s, b = bn_fold(ks[1], C_STEM)
    w = jnp.transpose(w, (2, 3, 1, 0)) * s[None, None, None, :]   # (kh,kw,ci,co)
    stem_w = (jnp.zeros((KCOL, CP), jnp.float32)
              .at[:9 * C_IN, :C_STEM].set(w.reshape(9 * C_IN, C_STEM)))
    stem_b = pad_b(b)

    # MBConv expand 1x1
    w = norm(ks[2], (C_EXP, C_STEM))
    s, b = bn_fold(ks[3], C_EXP)
    exp_w, exp_b = pad_w(w.T * s[None, :]), pad_b(b)

    # depthwise 3x3: torch (C, 1, 3, 3); BN scale folded into the tap weights
    w = norm(ks[4], (C_EXP, 1, 3, 3))
    s, b = bn_fold(ks[5], C_EXP)
    dw = jnp.transpose(w[:, 0], (1, 2, 0)).reshape(9, C_EXP) * s[None, :]
    dw_w = jnp.zeros((16, CP), jnp.float32).at[:9, :C_EXP].set(dw)
    dw_b = pad_b(b)

    # squeeze-excite
    se1_w, se1_b = pad_w(norm(ks[6], (C_SE, C_EXP)).T), pad_b(norm(ks[7], (C_SE,)))
    se2_w, se2_b = pad_w(norm(ks[8], (C_EXP, C_SE)).T), pad_b(norm(ks[9], (C_EXP,)))

    # MBConv project 1x1 (no activation)
    w = norm(ks[10], (C_STEM, C_EXP))
    s, b = bn_fold(ks[11], C_STEM)
    proj_w, proj_b = pad_w(w.T * s[None, :]), pad_b(b)

    # head conv 1x1 -> num_features
    w = norm(ks[12], (num_features, C_STEM))
    s, b = bn_fold(ks[13], num_features)
    head_w, head_b = pad_w(w.T * s[None, :]), pad_b(b)

    # replaced classifier: self.features._fc = nn.Linear(num_features, num_classes)
    fc_w = pad_w(norm(ks[14], (num_classes, num_features)).T)
    fc_b = pad_b(norm(ks[15], (num_classes,)))

    w_bank = jnp.stack([exp_w, se1_w, se2_w, proj_w, head_w, fc_w]
                       ).astype(jnp.bfloat16)                     # (6, CP, CP)
    b_bank = jnp.stack([stem_b, exp_b, se1_b, se2_b,
                        proj_b, head_b, fc_b, dw_b])              # (8, CP)

    return {"stem_w": stem_w.astype(jnp.bfloat16),   # (KCOL, CP) bf16
            "dw_w": dw_w,                            # (16, CP)   f32
            "W": w_bank,                             # (6, CP, CP) bf16
            "B": b_bank}                             # (8, CP)    f32


# ----------------------------------------------------------------------------
# Forward pass (Pollen.forward): backbone -> pooled features -> Linear logits.
# ----------------------------------------------------------------------------
@functools.partial(jax.jit, static_argnums=(2,))
def pollen_forward(params, img_nchw, num_classes):
    N, C, H, W = img_nchw.shape
    assert H % 2 == 0 and W % 2 == 0
    HO, WO = H // 2, W // 2
    HW = HO * WO
    assert WO % 8 == 0 and HW % 16 == 0 and 9 * C <= KCOL
    B = _pick_batch_block(N)
    assert B <= 8 and N % B == 0

    # NCHW -> NHWC, zero-pad spatial by 1, build the lane-dense bf16 im2col
    # slab for the stride-2 3x3 stem: (N, HW, 9*C -> padded to 128), tap-major
    # so it matches the stem weight layout (one K=128 matmul in the kernel).
    x = jnp.transpose(img_nchw, (0, 2, 3, 1))
    xp = jnp.pad(x, ((0, 0), (1, 1), (1, 1), (0, 0)))
    taps = [xp[:, kh:kh + 2 * HO:2, kw:kw + 2 * WO:2, :]
            for kh in range(3) for kw in range(3)]
    xcol = jnp.stack(taps, axis=3).reshape(N, HW, 9 * C)
    xcol = jnp.pad(xcol, ((0, 0), (0, 0), (0, KCOL - 9 * C))).astype(jnp.bfloat16)

    out = _pollen_pallas(xcol, params["stem_w"], params["dw_w"],
                         params["W"], params["B"], B=B, HO=HO, WO=WO)
    logits = out[:, :B, :].reshape(N, CP)            # (grid, B) -> batch order
    return logits[:, :num_classes]                   # strip lane padding


if __name__ == "__main__":
    NUM_CLASSES, NUM_FEATURES = 10, 32
    key = jax.random.PRNGKey(0)
    img_data = jax.random.normal(key, (2, 3, 16, 16), jnp.float32)  # NCHW
    params = init_params(jax.random.PRNGKey(1), NUM_CLASSES, NUM_FEATURES)

    out = pollen_forward(params, img_data, NUM_CLASSES)
    out = jax.block_until_ready(out)
    assert out.shape == (2, NUM_CLASSES), out.shape
    assert bool(jnp.all(jnp.isfinite(out)))
    print("KERNEL_OK")
</pallas_src>

<mosaic_0001>
module attributes {stable_mosaic.version = 11 : i64} {
  func.func @_pollen_fused_kernel(%arg0: i32, %arg1: memref<2x64x128xbf16, #tpu.memory_space<vmem>>, %arg2: memref<128x128xbf16, #tpu.memory_space<vmem>>, %arg3: memref<16x128xf32, #tpu.memory_space<vmem>>, %arg4: memref<6x128x128xbf16, #tpu.memory_space<vmem>>, %arg5: memref<8x128xf32, #tpu.memory_space<vmem>>, %arg6: memref<1x8x128xf32, #tpu.memory_space<vmem>>, %arg7: memref<128x128xf32, #tpu.memory_space<vmem>>, %arg8: memref<2x10x8x128xf32, #tpu.memory_space<vmem>>) attributes {dimension_semantics = [#tpu.dimension_semantics<parallel>], iteration_bounds = array<i64: 1>, scalar_prefetch = 0 : i64, scratch_operands = 2 : i64, tpu.core_type = #tpu.core_type<tc>, window_params = [{transform_indices = @transform_0, window_bounds = array<i64: 2, 64, 128>}, {pipeline_mode = #tpu.pipeline_mode<synchronous>, transform_indices = @transform_1, window_bounds = array<i64: 128, 128>}, {pipeline_mode = #tpu.pipeline_mode<synchronous>, transform_indices = @transform_2, window_bounds = array<i64: 16, 128>}, {pipeline_mode = #tpu.pipeline_mode<synchronous>, transform_indices = @transform_3, window_bounds = array<i64: 6, 128, 128>}, {pipeline_mode = #tpu.pipeline_mode<synchronous>, transform_indices = @transform_4, window_bounds = array<i64: 8, 128>}, {transform_indices = @transform_5, window_bounds = array<i64: 1, 8, 128>}]} {
    %c0 = arith.constant 0 : index
    %c0_0 = arith.constant 0 : index
    %c0_1 = arith.constant 0 : index
    %0 = vector.load %arg1[%c0, %c0_0, %c0_1] : memref<2x64x128xbf16, #tpu.memory_space<vmem>>, vector<2x64x128xbf16>
    %1 = vector.shape_cast %0 : vector<2x64x128xbf16> to vector<128x128xbf16>
    %c0_2 = arith.constant 0 : index
    %c0_3 = arith.constant 0 : index
    %2 = vector.load %arg2[%c0_2, %c0_3] : memref<128x128xbf16, #tpu.memory_space<vmem>>, vector<128x128xbf16>
    %cst = arith.constant dense<0.000000e+00> : vector<128x128xf32>
    %3 = tpu.matmul %1, %2, %cst {dimension_numbers = #tpu.dot_dimension_numbers<[1], [0], [0], [1], [0, 0, 1, 1], [], []>} : vector<128x128xbf16>, vector<128x128xbf16>, vector<128x128xf32> -> vector<128x128xf32>
    %c0_4 = arith.constant 0 : index
    %c0_5 = arith.constant 0 : index
    %4 = vector.load %arg5[%c0_4, %c0_5] : memref<8x128xf32, #tpu.memory_space<vmem>>, vector<1x128xf32>
    %5 = vector.broadcast %4 : vector<1x128xf32> to vector<128x128xf32>
    %6 = arith.addf %3, %5 : vector<128x128xf32>
    %7 = arith.negf %6 : vector<128x128xf32>
    %8 = math.exp %7 : vector<128x128xf32>
    %cst_6 = arith.constant 1.000000e+00 : f32
    %9 = vector.broadcast %cst_6 : f32 to vector<128x128xf32>
    %10 = arith.addf %9, %8 : vector<128x128xf32>
    %11 = arith.divf %9, %10 : vector<128x128xf32>
    %12 = arith.mulf %6, %11 : vector<128x128xf32>
    %c0_7 = arith.constant 0 : index
    %c0_8 = arith.constant 0 : index
    %13 = vector.load %arg7[%c0_7, %c0_8] : memref<128x128xf32, #tpu.memory_space<vmem>>, vector<128x128xf32>
    tpu.vector_store %arg7[%c0_7, %c0_8], %12 {strides = array<i32>} : memref<128x128xf32, #tpu.memory_space<vmem>>, vector<128x128xf32>,
    %14 = arith.truncf %12 : vector<128x128xf32> to vector<128x128xbf16>
    %c0_9 = arith.constant 0 : index
    %c0_10 = arith.constant 0 : index
    %c0_11 = arith.constant 0 : index
    %15 = vector.load %arg4[%c0_9, %c0_10, %c0_11] : memref<6x128x128xbf16, #tpu.memory_space<vmem>>, vector<1x128x128xbf16>
    %16 = vector.shape_cast %15 : vector<1x128x128xbf16> to vector<128x128xbf16>
    %cst_12 = arith.constant dense<0.000000e+00> : vector<128x128xf32>
    %17 = tpu.matmul %14, %16, %cst_12 {dimension_numbers = #tpu.dot_dimension_numbers<[1], [0], [0], [1], [0, 0, 1, 1], [], []>} : vector<128x128xbf16>, vector<128x128xbf16>, vector<128x128xf32> -> vector<128x128xf32>
    %c1 = arith.constant 1 : index
    %c0_13 = arith.constant 0 : index
    %18 = vector.load %arg5[%c1, %c0_13] : memref<8x128xf32, #tpu.memory_space<vmem>>, vector<1x128xf32>
    %19 = vector.broadcast %18 : vector<1x128xf32> to vector<128x128xf32>
    %20 = arith.addf %17, %19 : vector<128x128xf32>
    %21 = arith.negf %20 : vector<128x128xf32>
    %22 = math.exp %21 : vector<128x128xf32>
    %cst_14 = arith.constant 1.000000e+00 : f32
    %23 = vector.broadcast %cst_14 : f32 to vector<128x128xf32>
    %24 = arith.addf %23, %22 : vector<128x128xf32>
    %25 = arith.divf %23, %24 : vector<128x128xf32>
    %26 = arith.mulf %20, %25 : vector<128x128xf32>
    %27 = vector.shape_cast %26 : vector<128x128xf32> to vector<2x8x8x128xf32>
    %c0_15 = arith.constant 0 : index
    %c1_16 = arith.constant 1 : index
    %c0_17 = arith.constant 0 : index
    %c0_18 = arith.constant 0 : index
    %28 = vector.load %arg8[%c0_15, %c1_16, %c0_17, %c0_18] : memref<2x10x8x128xf32, #tpu.memory_space<vmem>>, vector<2x8x8x128xf32>
    tpu.vector_store %arg8[%c0_15, %c1_16, %c0_17, %c0_18], %27 {strides = array<i32>} : memref<2x10x8x128xf32, #tpu.memory_space<vmem>>, vector<2x8x8x128xf32>,
    %cst_19 = arith.constant 0.000000e+00 : f32
    %29 = vector.broadcast %cst_19 : f32 to vector<2x1x8x128xf32>
    %c0_20 = arith.constant 0 : index
    %c0_21 = arith.constant 0 : index
    %c0_22 = arith.constant 0 : index
    %c0_23 = arith.constant 0 : index
    %30 = vector.load %arg8[%c0_20, %c0_21, %c0_22, %c0_23] : memref<2x10x8x128xf32, #tpu.memory_space<vmem>>, vector<2x1x8x128xf32>
    tpu.vector_store %arg8[%c0_20, %c0_21, %c0_22, %c0_23], %29 {strides = array<i32>} : memref<2x10x8x128xf32, #tpu.memory_space<vmem>>, vector<2x1x8x128xf32>,
    %c0_24 = arith.constant 0 : index
    %c9 = arith.constant 9 : index
    %c0_25 = arith.constant 0 : index
    %c0_26 = arith.constant 0 : index
    %31 = vector.load %arg8[%c0_24, %c9, %c0_25, %c0_26] : memref<2x10x8x128xf32, #tpu.memory_space<vmem>>, vector<2x1x8x128xf32>
    tpu.vector_store %arg8[%c0_24, %c9, %c0_25, %c0_26], %29 {strides = array<i32>} : memref<2x10x8x128xf32, #tpu.memory_space<vmem>>, vector<2x1x8x128xf32>,
    %32 = tpu.iota {dimensions = array<i32: 0>} : vector<8x128xi32>
    %c0_i32 = arith.constant 0 : i32
    %33 = vector.broadcast %c0_i32 : i32 to vector<8x128xi32>
    %34 = arith.cmpi sgt, %32, %33 : vector<8x128xi32>
    %35 = arith.extui %34 : vector<8x128xi1> to vector<8x128xi32>
    %36 = arith.sitofp %35 : vector<8x128xi32> to vector<8x128xf32>
    %c7_i32 = arith.constant 7 : i32
    %37 = vector.broadcast %c7_i32 : i32 to vector<8x128xi32>
    %38 = arith.cmpi slt, %32, %37 : vector<8x128xi32>
    %39 = arith.extui %38 : vector<8x128xi1> to vector<8x128xi32>
    %40 = arith.sitofp %39 : vector<8x128xi32> to vector<8x128xf32>
    %c0_27 = arith.constant 0 : index
    %c0_28 = arith.constant 0 : index
    %41 = vector.load %arg3[%c0_27, %c0_28] : memref<16x128xf32, #tpu.memory_space<vmem>>, vector<16x128xf32>
    %cst_29 = arith.constant 0.000000e+00 : f32
    %42 = vector.broadcast %cst_29 : f32 to vector<16x8x128xf32>
    %c0_30 = arith.constant 0 : index
    %c0_31 = arith.constant 0 : index
    %c0_32 = arith.constant 0 : index
    %c0_33 = arith.constant 0 : index
    %43 = vector.load %arg8[%c0_30, %c0_31, %c0_32, %c0_33] : memref<2x10x8x128xf32, #tpu.memory_space<vmem>>, vector<2x8x8x128xf32>
    %44 = vector.shape_cast %43 : vector<2x8x8x128xf32> to vector<16x8x128xf32>
    %45 = vector.extract_strided_slice %41 {offsets = [0, 0], sizes = [1, 128], strides = [1, 1]} : vector<16x128xf32> to vector<1x128xf32>
    %46 = vector.shape_cast %45 : vector<1x128xf32> to vector<1x1x128xf32>
    %c1_i32 = arith.constant 1 : i32
    %47 = tpu.dynamic_rotate %44 by %c1_i32 dim 1 : vector<16x8x128xf32>, i32 -> vector<16x8x128xf32>
    %48 = vector.shape_cast %36 : vector<8x128xf32> to vector<1x8x128xf32>
    %49 = vector.broadcast %48 : vector<1x8x128xf32> to vector<16x8x128xf32>
    %50 = arith.mulf %47, %49 : vector<16x8x128xf32>
    %51 = vector.broadcast %46 : vector<1x1x128xf32> to vector<16x8x128xf32>
    %52 = arith.mulf %50, %51 : vector<16x8x128xf32>
    %53 = arith.addf %42, %52 : vector<16x8x128xf32>
    %54 = vector.extract_strided_slice %41 {offsets = [1, 0], sizes = [1, 128], strides = [1, 1]} : vector<16x128xf32> to vector<1x128xf32>
    %55 = vector.shape_cast %54 : vector<1x128xf32> to vector<1x1x128xf32>
    %56 = vector.broadcast %55 : vector<1x1x128xf32> to vector<16x8x128xf32>
    %57 = arith.mulf %44, %56 : vector<16x8x128xf32>
    %58 = arith.addf %53, %57 : vector<16x8x128xf32>
    %59 = vector.extract_strided_slice %41 {offsets = [2, 0], sizes = [1, 128], strides = [1, 1]} : vector<16x128xf32> to vector<1x128xf32>
    %60 = vector.shape_cast %59 : vector<1x128xf32> to vector<1x1x128xf32>
    %c7_i32_34 = arith.constant 7 : i32
    %61 = tpu.dynamic_rotate %44 by %c7_i32_34 dim 1 : vector<16x8x128xf32>, i32 -> vector<16x8x128xf32>
    %62 = vector.shape_cast %40 : vector<8x128xf32> to vector<1x8x128xf32>
    %63 = vector.broadcast %62 : vector<1x8x128xf32> to vector<16x8x128xf32>
    %64 = arith.mulf %61, %63 : vector<16x8x128xf32>
    %65 = vector.broadcast %60 : vector<1x1x128xf32> to vector<16x8x128xf32>
    %66 = arith.mulf %64, %65 : vector<16x8x128xf32>
    %67 = arith.addf %58, %66 : vector<16x8x128xf32>
    %c0_35 = arith.constant 0 : index
    %c1_36 = arith.constant 1 : index
    %c0_37 = arith.constant 0 : index
    %c0_38 = arith.constant 0 : index
    %68 = vector.load %arg8[%c0_35, %c1_36, %c0_37, %c0_38] : memref<2x10x8x128xf32, #tpu.memory_space<vmem>>, vector<2x8x8x128xf32>
    %69 = vector.shape_cast %68 : vector<2x8x8x128xf32> to vector<16x8x128xf32>
    %70 = vector.extract_strided_slice %41 {offsets = [3, 0], sizes = [1, 128], strides = [1, 1]} : vector<16x128xf32> to vector<1x128xf32>
    %71 = vector.shape_cast %70 : vector<1x128xf32> to vector<1x1x128xf32>
    %c1_i32_39 = arith.constant 1 : i32
    %72 = tpu.dynamic_rotate %69 by %c1_i32_39 dim 1 : vector<16x8x128xf32>, i32 -> vector<16x8x128xf32>
    %73 = vector.shape_cast %36 : vector<8x128xf32> to vector<1x8x128xf32>
    %74 = vector.broadcast %73 : vector<1x8x128xf32> to vector<16x8x128xf32>
    %75 = arith.mulf %72, %74 : vector<16x8x128xf32>
    %76 = vector.broadcast %71 : vector<1x1x128xf32> to vector<16x8x128xf32>
    %77 = arith.mulf %75, %76 : vector<16x8x128xf32>
    %78 = arith.addf %67, %77 : vector<16x8x128xf32>
    %79 = vector.extract_strided_slice %41 {offsets = [4, 0], sizes = [1, 128], strides = [1, 1]} : vector<16x128xf32> to vector<1x128xf32>
    %80 = vector.shape_cast %79 : vector<1x128xf32> to vector<1x1x128xf32>
    %81 = vector.broadcast %80 : vector<1x1x128xf32> to vector<16x8x128xf32>
    %82 = arith.mulf %69, %81 : vector<16x8x128xf32>
    %83 = arith.addf %78, %82 : vector<16x8x128xf32>
    %84 = vector.extract_strided_slice %41 {offsets = [5, 0], sizes = [1, 128], strides = [1, 1]} : vector<16x128xf32> to vector<1x128xf32>
    %85 = vector.shape_cast %84 : vector<1x128xf32> to vector<1x1x128xf32>
    %c7_i32_40 = arith.constant 7 : i32
    %86 = tpu.dynamic_rotate %69 by %c7_i32_40 dim 1 : vector<16x8x128xf32>, i32 -> vector<16x8x128xf32>
    %87 = vector.shape_cast %40 : vector<8x128xf32> to vector<1x8x128xf32>
    %88 = vector.broadcast %87 : vector<1x8x128xf32> to vector<16x8x128xf32>
    %89 = arith.mulf %86, %88 : vector<16x8x128xf32>
    %90 = vector.broadcast %85 : vector<1x1x128xf32> to vector<16x8x128xf32>
    %91 = arith.mulf %89, %90 : vector<16x8x128xf32>
    %92 = arith.addf %83, %91 : vector<16x8x128xf32>
    %c0_41 = arith.constant 0 : index
    %c2 = arith.constant 2 : index
    %c0_42 = arith.constant 0 : index
    %c0_43 = arith.constant 0 : index
    %93 = vector.load %arg8[%c0_41, %c2, %c0_42, %c0_43] : memref<2x10x8x128xf32, #tpu.memory_space<vmem>>, vector<2x8x8x128xf32>
    %94 = vector.shape_cast %93 : vector<2x8x8x128xf32> to vector<16x8x128xf32>
    %95 = vector.extract_strided_slice %41 {offsets = [6, 0], sizes = [1, 128], strides = [1, 1]} : vector<16x128xf32> to vector<1x128xf32>
    %96 = vector.shape_cast %95 : vector<1x128xf32> to vector<1x1x128xf32>
    %c1_i32_44 = arith.constant 1 : i32
    %97 = tpu.dynamic_rotate %94 by %c1_i32_44 dim 1 : vector<16x8x128xf32>, i32 -> vector<16x8x128xf32>
    %98 = vector.shape_cast %36 : vector<8x128xf32> to vector<1x8x128xf32>
    %99 = vector.broadcast %98 : vector<1x8x128xf32> to vector<16x8x128xf32>
    %100 = arith.mulf %97, %99 : vector<16x8x128xf32>
    %101 = vector.broadcast %96 : vector<1x1x128xf32> to vector<16x8x128xf32>
    %102 = arith.mulf %100, %101 : vector<16x8x128xf32>
    %103 = arith.addf %92, %102 : vector<16x8x128xf32>
    %104 = vector.extract_strided_slice %41 {offsets = [7, 0], sizes = [1, 128], strides = [1, 1]} : vector<16x128xf32> to vector<1x128xf32>
    %105 = vector.shape_cast %104 : vector<1x128xf32> to vector<1x1x128xf32>
    %106 = vector.broadcast %105 : vector<1x1x128xf32> to vector<16x8x128xf32>
    %107 = arith.mulf %94, %106 : vector<16x8x128xf32>
    %108 = arith.addf %103, %107 : vector<16x8x128xf32>
    %109 = vector.extract_strided_slice %41 {offsets = [8, 0], sizes = [1, 128], strides = [1, 1]} : vector<16x128xf32> to vector<1x128xf32>
    %110 = vector.shape_cast %109 : vector<1x128xf32> to vector<1x1x128xf32>
    %c7_i32_45 = arith.constant 7 : i32
    %111 = tpu.dynamic_rotate %94 by %c7_i32_45 dim 1 : vector<16x8x128xf32>, i32 -> vector<16x8x128xf32>
    %112 = vector.shape_cast %40 : vector<8x128xf32> to vector<1x8x128xf32>
    %113 = vector.broadcast %112 : vector<1x8x128xf32> to vector<16x8x128xf32>
    %114 = arith.mulf %111, %113 : vector<16x8x128xf32>
    %115 = vector.broadcast %110 : vector<1x1x128xf32> to vector<16x8x128xf32>
    %116 = arith.mulf %114, %115 : vector<16x8x128xf32>
    %117 = arith.addf %108, %116 : vector<16x8x128xf32>
    %118 = vector.shape_cast %117 : vector<16x8x128xf32> to vector<128x128xf32>
    %c7 = arith.constant 7 : index
    %c0_46 = arith.constant 0 : index
    %119 = vector.load %arg5[%c7, %c0_46] : memref<8x128xf32, #tpu.memory_space<vmem>>, vector<1x128xf32>
    %120 = vector.broadcast %119 : vector<1x128xf32> to vector<128x128xf32>
    %121 = arith.addf %118, %120 : vector<128x128xf32>
    %122 = arith.negf %121 : vector<128x128xf32>
    %123 = math.exp %122 : vector<128x128xf32>
    %cst_47 = arith.constant 1.000000e+00 : f32
    %124 = vector.broadcast %cst_47 : f32 to vector<128x128xf32>
    %125 = arith.addf %124, %123 : vector<128x128xf32>
    %126 = arith.divf %124, %125 : vector<128x128xf32>
    %127 = arith.mulf %121, %126 : vector<128x128xf32>
    %128 = vector.shape_cast %127 : vector<128x128xf32> to vector<2x64x128xf32>
    %cst_48 = arith.constant dense<0.000000e+00> : vector<2x128xf32>
    %129 = vector.multi_reduction <add>, %128, %cst_48 [1] : vector<2x64x128xf32> to vector<2x128xf32>
    %cst_49 = arith.constant 6.400000e+01 : f32
    %130 = vector.broadcast %cst_49 : f32 to vector<2x128xf32>
    %131 = arith.divf %129, %130 : vector<2x128xf32>
    %132 = arith.truncf %131 : vector<2x128xf32> to vector<2x128xbf16>
    %c1_50 = arith.constant 1 : index
    %c0_51 = arith.constant 0 : index
    %c0_52 = arith.constant 0 : index
    %133 = vector.load %arg4[%c1_50, %c0_51, %c0_52] : memref<6x128x128xbf16, #tpu.memory_space<vmem>>, vector<1x128x128xbf16>
    %134 = vector.shape_cast %133 : vector<1x128x128xbf16> to vector<128x128xbf16>
    %cst_53 = arith.constant dense<0.000000e+00> : vector<2x128xf32>
    %135 = tpu.matmul %132, %134, %cst_53 {dimension_numbers = #tpu.dot_dimension_numbers<[1], [0], [0], [1], [0, 0, 1, 1], [], []>} : vector<2x128xbf16>, vector<128x128xbf16>, vector<2x128xf32> -> vector<2x128xf32>
    %c2_54 = arith.constant 2 : index
    %c0_55 = arith.constant 0 : index
    %136 = vector.load %arg5[%c2_54, %c0_55] : memref<8x128xf32, #tpu.memory_space<vmem>>, vector<1x128xf32>
    %137 = vector.broadcast %136 : vector<1x128xf32> to vector<2x128xf32>
    %138 = arith.addf %135, %137 : vector<2x128xf32>
    %139 = arith.negf %138 : vector<2x128xf32>
    %140 = math.exp %139 : vector<2x128xf32>
    %cst_56 = arith.constant 1.000000e+00 : f32
    %141 = vector.broadcast %cst_56 : f32 to vector<2x128xf32>
    %142 = arith.addf %141, %140 : vector<2x128xf32>
    %143 = arith.divf %141, %142 : vector<2x128xf32>
    %144 = arith.mulf %138, %143 : vector<2x128xf32>
    %145 = arith.truncf %144 : vector<2x128xf32> to vector<2x128xbf16>
    %c2_57 = arith.constant 2 : index
    %c0_58 = arith.constant 0 : index
    %c0_59 = arith.constant 0 : index
    %146 = vector.load %arg4[%c2_57, %c0_58, %c0_59] : memref<6x128x128xbf16, #tpu.memory_space<vmem>>, vector<1x128x128xbf16>
    %147 = vector.shape_cast %146 : vector<1x128x128xbf16> to vector<128x128xbf16>
    %cst_60 = arith.constant dense<0.000000e+00> : vector<2x128xf32>
    %148 = tpu.matmul %145, %147, %cst_60 {dimension_numbers = #tpu.dot_dimension_numbers<[1], [0], [0], [1], [0, 0, 1, 1], [], []>} : vector<2x128xbf16>, vector<128x128xbf16>, vector<2x128xf32> -> vector<2x128xf32>
    %c3 = arith.constant 3 : index
    %c0_61 = arith.constant 0 : index
    %149 = vector.load %arg5[%c3, %c0_61] : memref<8x128xf32, #tpu.memory_space<vmem>>, vector<1x128xf32>
    %150 = vector.broadcast %149 : vector<1x128xf32> to vector<2x128xf32>
    %151 = arith.addf %148, %150 : vector<2x128xf32>
    %152 = arith.negf %151 : vector<2x128xf32>
    %153 = math.exp %152 : vector<2x128xf32>
    %cst_62 = arith.constant 1.000000e+00 : f32
    %154 = vector.broadcast %cst_62 : f32 to vector<2x128xf32>
    %155 = arith.addf %154, %153 : vector<2x128xf32>
    %156 = arith.divf %154, %155 : vector<2x128xf32>
    %157 = vector.shape_cast %156 : vector<2x128xf32> to vector<2x1x128xf32>
    %158 = vector.broadcast %157 : vector<2x1x128xf32> to vector<2x64x128xf32>
    %159 = arith.mulf %128, %158 : vector<2x64x128xf32>
    %160 = vector.shape_cast %159 : vector<2x64x128xf32> to vector<128x128xf32>
    %161 = arith.truncf %160 : vector<128x128xf32> to vector<128x128xbf16>
    %c3_63 = arith.constant 3 : index
    %c0_64 = arith.constant 0 : index
    %c0_65 = arith.constant 0 : index
    %162 = vector.load %arg4[%c3_63, %c0_64, %c0_65] : memref<6x128x128xbf16, #tpu.memory_space<vmem>>, vector<1x128x128xbf16>
    %163 = vector.shape_cast %162 : vector<1x128x128xbf16> to vector<128x128xbf16>
    %cst_66 = arith.constant dense<0.000000e+00> : vector<128x128xf32>
    %164 = tpu.matmul %161, %163, %cst_66 {dimension_numbers = #tpu.dot_dimension_numbers<[1], [0], [0], [1], [0, 0, 1, 1], [], []>} : vector<128x128xbf16>, vector<128x128xbf16>, vector<128x128xf32> -> vector<128x128xf32>
    %c4 = arith.constant 4 : index
    %c0_67 = arith.constant 0 : index
    %165 = vector.load %arg5[%c4, %c0_67] : memref<8x128xf32, #tpu.memory_space<vmem>>, vector<1x128xf32>
    %166 = vector.broadcast %165 : vector<1x128xf32> to vector<128x128xf32>
    %167 = arith.addf %164, %166 : vector<128x128xf32>
    %c0_68 = arith.constant 0 : index
    %c0_69 = arith.constant 0 : index
    %168 = vector.load %arg7[%c0_68, %c0_69] : memref<128x128xf32, #tpu.memory_space<vmem>>, vector<128x128xf32>
    %169 = arith.addf %167, %168 : vector<128x128xf32>
    %170 = arith.truncf %169 : vector<128x128xf32> to vector<128x128xbf16>
    %c4_70 = arith.constant 4 : index
    %c0_71 = arith.constant 0 : index
    %c0_72 = arith.constant 0 : index
    %171 = vector.load %arg4[%c4_70, %c0_71, %c0_72] : memref<6x128x128xbf16, #tpu.memory_space<vmem>>, vector<1x128x128xbf16>
    %172 = vector.shape_cast %171 : vector<1x128x128xbf16> to vector<128x128xbf16>
    %cst_73 = arith.constant dense<0.000000e+00> : vector<128x128xf32>
    %173 = tpu.matmul %170, %172, %cst_73 {dimension_numbers = #tpu.dot_dimension_numbers<[1], [0], [0], [1], [0, 0, 1, 1], [], []>} : vector<128x128xbf16>, vector<128x128xbf16>, vector<128x128xf32> -> vector<128x128xf32>
    %c5 = arith.constant 5 : index
    %c0_74 = arith.constant 0 : index
    %174 = vector.load %arg5[%c5, %c0_74] : memref<8x128xf32, #tpu.memory_space<vmem>>, vector<1x128xf32>
    %175 = vector.broadcast %174 : vector<1x128xf32> to vector<128x128xf32>
    %176 = arith.addf %173, %175 : vector<128x128xf32>
    %177 = arith.negf %176 : vector<128x128xf32>
    %178 = math.exp %177 : vector<128x128xf32>
    %cst_75 = arith.constant 1.000000e+00 : f32
    %179 = vector.broadcast %cst_75 : f32 to vector<128x128xf32>
    %180 = arith.addf %179, %178 : vector<128x128xf32>
    %181 = arith.divf %179, %180 : vector<128x128xf32>
    %182 = arith.mulf %176, %181 : vector<128x128xf32>
    %183 = vector.shape_cast %182 : vector<128x128xf32> to vector<2x64x128xf32>
    %cst_76 = arith.constant dense<0.000000e+00> : vector<2x128xf32>
    %184 = vector.multi_reduction <add>, %183, %cst_76 [1] : vector<2x64x128xf32> to vector<2x128xf32>
    %cst_77 = arith.constant 6.400000e+01 : f32
    %185 = vector.broadcast %cst_77 : f32 to vector<2x128xf32>
    %186 = arith.divf %184, %185 : vector<2x128xf32>
    %187 = arith.truncf %186 : vector<2x128xf32> to vector<2x128xbf16>
    %c5_78 = arith.constant 5 : index
    %c0_79 = arith.constant 0 : index
    %c0_80 = arith.constant 0 : index
    %188 = vector.load %arg4[%c5_78, %c0_79, %c0_80] : memref<6x128x128xbf16, #tpu.memory_space<vmem>>, vector<1x128x128xbf16>
    %189 = vector.shape_cast %188 : vector<1x128x128xbf16> to vector<128x128xbf16>
    %cst_81 = arith.constant dense<0.000000e+00> : vector<2x128xf32>
    %190 = tpu.matmul %187, %189, %cst_81 {dimension_numbers = #tpu.dot_dimension_numbers<[1], [0], [0], [1], [0, 0, 1, 1], [], []>} : vector<2x128xbf16>, vector<128x128xbf16>, vector<2x128xf32> -> vector<2x128xf32>
    %c6 = arith.constant 6 : index
    %c0_82 = arith.constant 0 : index
    %191 = vector.load %arg5[%c6, %c0_82] : memref<8x128xf32, #tpu.memory_space<vmem>>, vector<1x128xf32>
    %192 = vector.broadcast %191 : vector<1x128xf32> to vector<2x128xf32>
    %193 = arith.addf %190, %192 : vector<2x128xf32>
    %194 = vector.shape_cast %193 : vector<2x128xf32> to vector<1x2x128xf32>
    %c0_83 = arith.constant 0 : index
    %c0_84 = arith.constant 0 : index
    %c0_85 = arith.constant 0 : index
    %195 = vector.load %arg6[%c0_83, %c0_84, %c0_85] : memref<1x8x128xf32, #tpu.memory_space<vmem>>, vector<1x2x128xf32>
    tpu.vector_store %arg6[%c0_83, %c0_84, %c0_85], %194 {strides = array<i32>} : memref<1x8x128xf32, #tpu.memory_space<vmem>>, vector<1x2x128xf32>,
    return
  }
  func.func @transform_0(%arg0: i32) -> (i32, i32, i32) {
    %c0_i32 = arith.constant 0 : i32
    %c0_i32_0 = arith.constant 0 : i32
    %c0_i32_1 = arith.constant 0 : i32
    return %arg0, %c0_i32, %c0_i32_0 : i32, i32, i32
  }
  func.func @transform_1(%arg0: i32) -> (i32, i32) {
    %c0_i32 = arith.constant 0 : i32
    %c0_i32_0 = arith.constant 0 : i32
    %c0_i32_1 = arith.constant 0 : i32
    return %c0_i32, %c0_i32_0 : i32, i32
  }
  func.func @transform_2(%arg0: i32) -> (i32, i32) {
    %c0_i32 = arith.constant 0 : i32
    %c0_i32_0 = arith.constant 0 : i32
    %c0_i32_1 = arith.constant 0 : i32
    return %c0_i32, %c0_i32_0 : i32, i32
  }
  func.func @transform_3(%arg0: i32) -> (i32, i32, i32) {
    %c0_i32 = arith.constant 0 : i32
    %c0_i32_0 = arith.constant 0 : i32
    %c0_i32_1 = arith.constant 0 : i32
    %c0_i32_2 = arith.constant 0 : i32
    return %c0_i32, %c0_i32_0, %c0_i32_1 : i32, i32, i32
  }
  func.func @transform_4(%arg0: i32) -> (i32, i32) {
    %c0_i32 = arith.constant 0 : i32
    %c0_i32_0 = arith.constant 0 : i32
    %c0_i32_1 = arith.constant 0 : i32
    return %c0_i32, %c0_i32_0 : i32, i32
  }
  func.func @transform_5(%arg0: i32) -> (i32, i32, i32) {
    %c0_i32 = arith.constant 0 : i32
    %c0_i32_0 = arith.constant 0 : i32
    %c0_i32_1 = arith.constant 0 : i32
    return %arg0, %c0_i32, %c0_i32_0 : i32, i32, i32
  }
}

</mosaic_0001>

<bundles_post_ra>
// kernel: pollen_forward.1
= control target key start
LH: loop header
LB: loop body
LE: loop exit
PB: predicated region body
PF: predicated region fallthrough
CT: control target
= control target key end

     0   :  { %vm3194_vm2 = vmmov 0   ;;  %vm1452_vm3 = vcmask 1041409   ;;  %s4362_s1 = inlined_call_operand.vmem [shape: bf16[128,128], index: 1, kind: input, shape index: {}]   ;;  %s4363_s0 = inlined_call_operand.vmem [shape: bf16[2,64,128], index: 0, kind: input, shape index: {}]   ;;  %s4364_s3 = inlined_call_operand.vmem [shape: bf16[6,128,128], index: 3, kind: input, shape index: {}]   ;;  %s4365_s4 = inlined_call_operand.vmem [shape: f32[8,128], index: 4, kind: input, shape index: {}]   ;;  %s4366_s2 = inlined_call_operand.vmem [shape: f32[16,128], index: 2, kind: input, shape index: {}]   ;;  %s4367_s5 = inlined_call_operand.vmem [shape: f32[1,8,128], index: 5, kind: output, shape index: {}]  }
   0x1   :  { %v2865_v0 = vld [vmem:[%s4362_s1] sm:$0xff]   ;;  %v2866_v1 = vld [vmem:[%s4362_s1 + $0x8] sm:$0xff]   ;;  %v2867_v2 = vld [vmem:[%s4362_s1 + $0x10] sm:$0xff]  }
   0x2   :  { %2674 = vmatprep.subr.bf16.mxu0 %v2865_v0  ;;  %v2868_v3 = vld [vmem:[%s4362_s1 + $0x18] sm:$0xff]   ;;  %v2873_v4 = vld [vmem:[%s4363_s0] sm:$0xff]   ;;  %v2870_v6 = vld [vmem:[%s4362_s1 + $0x28] sm:$0xff]  }
   0x3   :  { %2675 = vmatpush3.bf16.msra.mxu0 %v2865_v0  ;;  %2690 = vmatprep.mubr.bf16.mxu0 %v2873_v4  ;;  %v2869_v5 = vld [vmem:[%s4362_s1 + $0x20] sm:$0xff]   ;;  %v2871_v7 = vld [vmem:[%s4362_s1 + $0x30] sm:$0xff]   ;;  %v2872_v8 = vld [vmem:[%s4362_s1 + $0x38] sm:$0xff]  }
   0x4   :  { %2676 = vmatprep.subr.bf16.mxu0 %v2866_v1  ;;  %v2874_v9 = vld [vmem:[%s4363_s0 + $0x8] sm:$0xff]   ;;  %v2875_v10 = vld [vmem:[%s4363_s0 + $0x10] sm:$0xff]   ;;  %v2876_v11 = vld [vmem:[%s4363_s0 + $0x18] sm:$0xff]  }
   0x5   :  { %v2877_v12 = vld [vmem:[%s4363_s0 + $0x20] sm:$0xff]   ;;  %v2878_v13 = vld [vmem:[%s4363_s0 + $0x28] sm:$0xff]   ;;  %v2879_v14 = vld [vmem:[%s4363_s0 + $0x30] sm:$0xff]  }
   0x6   :  { %v2880_v15 = vld [vmem:[%s4363_s0 + $0x38] sm:$0xff]   ;;  %v2881_v16 = vld [vmem:[%s4364_s3] sm:$0xff]   ;;  %v2882_v17 = vld [vmem:[%s4364_s3 + $0x8] sm:$0xff]  }
   0x7   :  { %2677 = vmatpush3.bf16.msra.mxu0 %v2866_v1  ;;  %2706 = vmatprep.subr.bf16.mxu1 %v2881_v16  ;;  %v2883_v18 = vld [vmem:[%s4364_s3 + $0x10] sm:$0xff]   ;;  %v2884_v19 = vld [vmem:[%s4364_s3 + $0x18] sm:$0xff]   ;;  %v2885_v20 = vld [vmem:[%s4364_s3 + $0x20] sm:$0xff]  }
   0x8   :  { %2678 = vmatprep.subr.bf16.mxu0 %v2867_v2  ;;  %2707 = vmatpush3.bf16.msra.mxu1 %v2881_v16  ;;  %v2886_v21 = vld [vmem:[%s4364_s3 + $0x28] sm:$0xff]   ;;  %v2887_v22 = vld [vmem:[%s4364_s3 + $0x30] sm:$0xff]   ;;  %v2888_v23 = vld [vmem:[%s4364_s3 + $0x38] sm:$0xff]  }
   0x9   :  { %2708 = vmatprep.subr.bf16.mxu1 %v2882_v17  ;;  %v3301_v24 = vld [vmem:[%s4365_s4] ss:$0 sm:$0xff] }
   0xb   :  { %2679 = vmatpush3.bf16.msra.mxu0 %v2867_v2 }
   0xc   :  { %2680 = vmatprep.subr.bf16.mxu0 %v2868_v3  ;;  %2709 = vmatpush3.bf16.msra.mxu1 %v2882_v17 }
   0xd   :  { %2710 = vmatprep.subr.bf16.mxu1 %v2883_v18 }
   0xf   :  { %2681 = vmatpush3.bf16.msra.mxu0 %v2868_v3 }
  0x10   :  { %2682 = vmatprep.subr.bf16.mxu0 %v2869_v5  ;;  %2711 = vmatpush3.bf16.msra.mxu1 %v2883_v18 }
  0x11   :  { %2712 = vmatprep.subr.bf16.mxu1 %v2884_v19 }
  0x13   :  { %2683 = vmatpush3.bf16.msra.mxu0 %v2869_v5 }
  0x14   :  { %2684 = vmatprep.subr.bf16.mxu0 %v2870_v6  ;;  %2713 = vmatpush3.bf16.msra.mxu1 %v2884_v19 }
  0x15   :  { %2714 = vmatprep.subr.bf16.mxu1 %v2885_v20 }
  0x17   :  { %2685 = vmatpush3.bf16.msra.mxu0 %v2870_v6 }
  0x18   :  { %2686 = vmatprep.subr.bf16.mxu0 %v2871_v7  ;;  %2715 = vmatpush3.bf16.msra.mxu1 %v2885_v20 }
  0x19   :  { %2716 = vmatprep.subr.bf16.mxu1 %v2886_v21 }
  0x1b   :  { %2687 = vmatpush3.bf16.msra.mxu0 %v2871_v7 }
  0x1c   :  { %2688 = vmatprep.subr.bf16.mxu0 %v2872_v8  ;;  %2717 = vmatpush3.bf16.msra.mxu1 %v2886_v21 }
  0x1d   :  { %2718 = vmatprep.subr.bf16.mxu1 %v2887_v22 }
  0x1f   :  { %2689 = vmatpush3.bf16.msra.mxu0 %v2872_v8 }
  0x20   :  { %2719 = vmatpush3.bf16.msra.mxu1 %v2887_v22 }
  0x21   :  { %2720 = vmatprep.subr.bf16.mxu1 %v2888_v23 }
  0x22   :  { %2691 = vmatmul.mubr.bf16.vlgmr.msra.gmra.mrb[0].mxu0 %v2874_v9 }
  0x23   :  { %2694 = vmatprep.mubr.bf16.mxu0 %v2875_v10 }
  0x24   :  { %2721 = vmatpush3.bf16.msra.mxu1 %v2888_v23 }
  0x2a   :  { %2695 = vmatmul.mubr.bf16.gmra.mrb[4].mxu0 %v2876_v11 }
  0x2b   :  { %2698 = vmatprep.mubr.bf16.mxu0 %v2877_v12 }
  0x32   :  { %2699 = vmatmul.mubr.bf16.gmra.mrb[8].mxu0 %v2878_v13 }
  0x33   :  { %2702 = vmatprep.mubr.bf16.mxu0 %v2879_v14 }
  0x3a   :  { %2703 = vmatmul.mubr.bf16.gmra.mrb[12].mxu0 %v2880_v15 }
  0xf5   :  { %v2692_v25 = vpop.f32.mrb[0].mxu0 }
  0xf6   :  { %v3304_v26 = vadd.f32 %v2692_v25, %v3301_v24  ;;  %v188_v27 = vpop.f32.mrb[1].mxu0 }
  0xf7   :  { %v3307_v28 = vadd.f32 %v3301_v24, %v188_v27  ;;  %v2693_v29 = vpop.f32.mrb[2].mxu0 }
  0xf8   :  { %v2382_v30 = vmul.f32 -1.442695, %v3304_v26  ;;  %v3311_v31 = vadd.f32 %v2693_v29, %v3301_v24  ;;  %v191_v32 = vpop.f32.mrb[3].mxu0 }
  0xf9   :  { %v2380_v33 = vmul.f32 -1.442695, %v3307_v28  ;;  %v3315_v34 = vadd.f32 %v3301_v24, %v191_v32 }
  0xfa   :  { %2929 = vpow2.f32 %v2382_v30  ;;  %v2383_v35 = vmul.f32 -1.442695, %v3311_v31 }
  0xfb   :  { %2931 = vpow2.f32 %v2380_v33  ;;  %v2381_v36 = vmul.f32 -1.442695, %v3315_v34 }
  0xfc   :  { %2933 = vpow2.f32 %v2383_v35 }
  0xfd   :  { %2935 = vpow2.f32 %v2381_v36  ;;  %v2696_v37 = vpop.f32.mrb[4].mxu0 }
  0xfe   :  { %v3320_v38 = vadd.f32 %v2696_v37, %v3301_v24  ;;  %v204_v39 = vpop.f32.mrb[5].mxu0 }
  0xff   :  { %v3323_v40 = vadd.f32 %v3301_v24, %v204_v39  ;;  %v2697_v41 = vpop.f32.mrb[6].mxu0 }
 0x100   :  { %v2386_v42 = vmul.f32 -1.442695, %v3320_v38  ;;  %v3327_v43 = vadd.f32 %v2697_v41, %v3301_v24  ;;  %v207_v44 = vpop.f32.mrb[7].mxu0 }
 0x101   :  { %v2384_v45 = vmul.f32 -1.442695, %v3323_v40  ;;  %v3331_v46 = vadd.f32 %v3301_v24, %v207_v44 }
 0x102   :  { %2937 = vpow2.f32 %v2386_v42  ;;  %v2387_v47 = vmul.f32 -1.442695, %v3327_v43 }
 0x103   :  { %2939 = vpow2.f32 %v2384_v45  ;;  %v2385_v48 = vmul.f32 -1.442695, %v3331_v46 }
 0x104   :  { %v2930_v49 = vpop.eup %2929  ;;  %2941 = vpow2.f32 %v2387_v47 }
 0x105   :  { %v2932_v50 = vpop.eup %2931  ;;  %v301_v51 = vadd.f32 1.0, %v2930_v49  ;;  %2943 = vpow2.f32 %v2385_v48  ;;  %v2700_v52 = vpop.f32.mrb[8].mxu0 }
 0x106   :  { %v2934_v53 = vpop.eup %2933  ;;  %v299_v54 = vadd.f32 1.0, %v2932_v50  ;;  %v3336_v55 = vadd.f32 %v2700_v52, %v3301_v24  ;;  %v220_v56 = vpop.f32.mrb[9].mxu0 }
 0x107   :  { %v2936_v57 = vpop.eup %2935  ;;  %2945 = vrcp.f32 %v301_v51  ;;  %v302_v58 = vadd.f32 1.0, %v2934_v53  ;;  %v3339_v59 = vadd.f32 %v3301_v24, %v220_v56  ;;  %v2701_v60 = vpop.f32.mrb[10].mxu0 }
 0x108   :  { %2947 = vrcp.f32 %v299_v54  ;;  %v300_v61 = vadd.f32 1.0, %v2936_v57  ;;  %v2390_v62 = vmul.f32 -1.442695, %v3336_v55  ;;  %v3343_v63 = vadd.f32 %v2701_v60, %v3301_v24  ;;  %v223_v0 = vpop.f32.mrb[11].mxu0 }
 0x109   :  { %2949 = vrcp.f32 %v302_v58  ;;  %v2388_v1 = vmul.f32 -1.442695, %v3339_v59  ;;  %v3347_v2 = vadd.f32 %v3301_v24, %v223_v0 }
 0x10a   :  { %2951 = vrcp.f32 %v300_v61  ;;  %v2391_v3 = vmul.f32 -1.442695, %v3343_v63 }
 0x10b   :  { %2953 = vpow2.f32 %v2390_v62  ;;  %v2389_v4 = vmul.f32 -1.442695, %v3347_v2 }
 0x10c   :  { %v2938_v5 = vpop.eup %2937  ;;  %2955 = vpow2.f32 %v2388_v1 }
 0x10d   :  { %v2940_v6 = vpop.eup %2939  ;;  %v305_v7 = vadd.f32 1.0, %v2938_v5  ;;  %2957 = vpow2.f32 %v2391_v3  ;;  %v2704_v8 = vpop.f32.mrb[12].mxu0 }
 0x10e   :  { %v2942_v9 = vpop.eup %2941  ;;  %v303_v10 = vadd.f32 1.0, %v2940_v6  ;;  %2959 = vpow2.f32 %v2389_v4  ;;  %v3352_v11 = vadd.f32 %v2704_v8, %v3301_v24  ;;  %v236_v12 = vpop.f32.mrb[13].mxu0 }
 0x10f   :  { %v2944_v13 = vpop.eup %2943  ;;  %2961 = vrcp.f32 %v305_v7  ;;  %v306_v14 = vadd.f32 1.0, %v2942_v9  ;;  %v3355_v15 = vadd.f32 %v3301_v24, %v236_v12  ;;  %v2705_v16 = vpop.f32.mrb[14].mxu0 }
 0x110   :  { %2963 = vrcp.f32 %v303_v10  ;;  %v304_v17 = vadd.f32 1.0, %v2944_v13  ;;  %v2394_v18 = vmul.f32 -1.442695, %v3352_v11  ;;  %v3359_v19 = vadd.f32 %v2705_v16, %v3301_v24  ;;  %v239_v20 = vpop.f32.mrb[15].mxu0 }
 0x111   :  { %v2946_v21 = vpop.eup %2945  ;;  %2965 = vrcp.f32 %v306_v14  ;;  %v2392_v22 = vmul.f32 -1.442695, %v3355_v15  ;;  %v3363_v23 = vadd.f32 %v3301_v24, %v239_v20  ;;  %v4368_v20 = vmov 0.0  }
 0x112   :  { %v2948_v25 = vpop.eup %2947  ;;  %2967 = vrcp.f32 %v304_v17  ;;  %v2395_v27 = vmul.f32 -1.442695, %v3359_v19  ;;  %v3377_v39 = vmul.f32 %v2946_v21, %v3304_v26  ;;  %2738 = vmatprep.subr.bf16.mxu0 %v4368_v20  ;;  %2758 = vmatprep.subr.bf16.mxu1 %v4368_v20 }
 0x113   :  { %v2950_v29 = vpop.eup %2949  ;;  %2969 = vpow2.f32 %v2394_v18  ;;  %v2393_v30 = vmul.f32 -1.442695, %v3363_v23  ;;  %v3371_v36 = vmul.f32 %v2948_v25, %v3307_v28 }
 0x114   :  { %v2952_v32 = vpop.eup %2951  ;;  %v3368_v33 = vmul.f32 %v2950_v29, %v3311_v31  ;;  %2971 = vpow2.f32 %v2392_v22  ;;  %4391 = vst [vmem:[#allocation7_spill] sm:$0xff] %v3377_v39 }
 0x115   :  { %v2954_v35 = vpop.eup %2953  ;;  %2973 = vpow2.f32 %v2395_v27  ;;  %4389 = vst [vmem:[#allocation5_spill] sm:$0xff] %v3371_v36  ;;  %v3374_v24 = vmul.f32 %v2952_v32, %v3315_v34 }
 0x116   :  { %4388 = vst [vmem:[#allocation4_spill] sm:$0xff] %v3368_v33  ;;  %v2956_v37 = vpop.eup %2955  ;;  %v309_v41 = vadd.f32 1.0, %v2954_v35  ;;  %2975 = vpow2.f32 %v2393_v30  ;;  %v380_v28 = vpack.c.bf16 %v3368_v33, %v3377_v39 }
 0x117   :  { %4390 = vst [vmem:[#allocation6_spill] sm:$0xff] %v3374_v24  ;;  %v2958_v42 = vpop.eup %2957  ;;  %v307_v44 = vadd.f32 1.0, %v2956_v37  ;;  %v379_v31 = vpack.c.bf16 %v3374_v24, %v3371_v36  ;;  %v687_v37 = vlaneseq }
 0x118   :  { %v2960_v45 = vpop.eup %2959  ;;  %2977 = vrcp.f32 %v309_v41  ;;  %v310_v47 = vadd.f32 1.0, %v2958_v42 }
 0x119   :  { %v2962_v48 = vpop.eup %2961  ;;  %2979 = vrcp.f32 %v307_v44  ;;  %v308_v34 = vadd.f32 1.0, %v2960_v45  ;;  %2722 = vmatprep.mubr.bf16.mxu1 %v379_v31  ;;  %v3457_v45 = vshrl.u32 %v687_v37, 7 }
 0x11a   :  { %v2964_v49 = vpop.eup %2963  ;;  %2981 = vrcp.f32 %v310_v47  ;;  %2723 = vmatmul.mubr.bf16.vlgmr.msra.gmra.mrb[0].mxu1 %v380_v28  ;;  %v3393_v57 = vmul.f32 %v2962_v48, %v3320_v38 }
 0x11b   :  { %v2966_v26 = vpop.eup %2965  ;;  %2983 = vrcp.f32 %v308_v34  ;;  %v3387_v53 = vmul.f32 %v2964_v49, %v3323_v40  ;;  %vm689_vm0 = vcmp.gt.s32.totalorder %v3457_v45, 0  ;;  %vm692_vm1 = vcmp.lt.s32.totalorder %v3457_v45, 7 }
 0x11c   :  { %v2968_v50 = vpop.eup %2967  ;;  %v3384_v51 = vmul.f32 %v2966_v26, %v3327_v43  ;;  %4395 = vst [vmem:[#allocation11_spill] sm:$0xff] %v3393_v57 }
 0x11d   :  { %v2970_v52 = vpop.eup %2969  ;;  %4393 = vst [vmem:[#allocation9_spill] sm:$0xff] %v3387_v53  ;;  %v3390_v54 = vmul.f32 %v2968_v50, %v3331_v46 }
 0x11e   :  { %4392 = vst [vmem:[#allocation8_spill] sm:$0xff] %v3384_v51  ;;  %v2972_v56 = vpop.eup %2971  ;;  %v313_v58 = vadd.f32 1.0, %v2970_v52  ;;  %v382_v40 = vpack.c.bf16 %v3384_v51, %v3393_v57  ;;  %v3469_v52 = vsub.s32 0, %v3457_v45 }
 0x11f   :  { %4394 = vst [vmem:[#allocation10_spill] sm:$0xff] %v3390_v54  ;;  %v2974_v60 = vpop.eup %2973  ;;  %v311_v61 = vadd.f32 1.0, %v2972_v56  ;;  %v381_v62 = vpack.c.bf16 %v3390_v54, %v3387_v53  ;;  %v783_v56 = vsub.s32 1, %v3457_v45 }
 0x120   :  { %v2976_v0 = vpop.eup %2975  ;;  %2985 = vrcp.f32 %v313_v58  ;;  %v314_v43 = vadd.f32 1.0, %v2974_v60  ;;  %4404 = vst [vmem:[#allocation20_spill] sm:$0xff] %v3469_v52 }
 0x121   :  { %2987 = vrcp.f32 %v311_v61  ;;  %v312_v1 = vadd.f32 1.0, %v2976_v0  ;;  %2726 = vmatprep.mubr.bf16.mxu1 %v381_v62  ;;  %v695_v61 = vld [vmem:[%s4366_s2] sm:$0xff]  ;;  %v713_v62 = vrot.slane %v4368_v20, 7 }
 0x122   :  { %v2978_v46 = vpop.eup %2977  ;;  %2989 = vrcp.f32 %v314_v43  ;;  %2727 = vmatmul.mubr.bf16.gmra.mrb[4].mxu1 %v382_v40  ;;  %v3477_v43 = vsel %vm689_vm0, 1.0, %v4368_v20 }
 0x123   :  { %v2980_v38 = vpop.eup %2979  ;;  %2991 = vrcp.f32 %v312_v1  ;;  %v3409_v8 = vmul.f32 %v2978_v46, %v3336_v55 }
 0x124   :  { %v2982_v3 = vpop.eup %2981  ;;  %v3403_v6 = vmul.f32 %v2980_v38, %v3339_v59 }
 0x125   :  { %v2984_v4 = vpop.eup %2983  ;;  %v3400_v5 = vmul.f32 %v2982_v3, %v3343_v63  ;;  %4399 = vst [vmem:[#allocation15_spill] sm:$0xff] %v3409_v8 }
 0x126   :  { %4397 = vst [vmem:[#allocation13_spill] sm:$0xff] %v3403_v6  ;;  %v3406_v7 = vmul.f32 %v2984_v4, %v3347_v2 }
 0x127   :  { %4396 = vst [vmem:[#allocation12_spill] sm:$0xff] %v3400_v5  ;;  %v384_v10 = vpack.c.bf16 %v3400_v5, %v3409_v8 }
 0x128   :  { %4398 = vst [vmem:[#allocation14_spill] sm:$0xff] %v3406_v7  ;;  %v383_v9 = vpack.c.bf16 %v3406_v7, %v3403_v6 }
 0x12a   :  { %v2986_v12 = vpop.eup %2985  ;;  %2730 = vmatprep.mubr.bf16.mxu1 %v383_v9 }
 0x12b   :  { %v2988_v13 = vpop.eup %2987  ;;  %2731 = vmatmul.mubr.bf16.gmra.mrb[8].mxu1 %v384_v10  ;;  %v3425_v16 = vmul.f32 %v2986_v12, %v3352_v11  ;;  %v3485_v10 = vrot.slane %v695_v61, %v3469_v52  ;;  %v3487_v12 = vrot.slane %v695_v61, %v783_v56 }
 0x12c   :  { %v2990_v63 = vpop.eup %2989  ;;  %v3419_v2 = vmul.f32 %v2988_v13, %v3355_v15  ;;  %v3436_v15 = vld [vmem:[%s4365_s4 + $0x1] ss:$0 sm:$0xff] }
 0x12d   :  { %v2992_v14 = vpop.eup %2991  ;;  %v3416_v59 = vmul.f32 %v2990_v63, %v3359_v19  ;;  %4403 = vst [vmem:[#allocation19_spill] sm:$0xff] %v3425_v16  ;;  %v785_v37 = vmul.f32 0.0, %v3487_v12 }
 0x12e   :  { %4401 = vst [vmem:[#allocation17_spill] sm:$0xff] %v3419_v2  ;;  %v3422_v55 = vmul.f32 %v2992_v14, %v3363_v23  ;;  %v851_v14 = vsub.s32 2, %v3457_v45 }
 0x12f   :  { %4400 = vst [vmem:[#allocation16_spill] sm:$0xff] %v3416_v59  ;;  %v386_v18 = vpack.c.bf16 %v3416_v59, %v3425_v16 }
 0x130   :  { %4402 = vst [vmem:[#allocation18_spill] sm:$0xff] %v3422_v55  ;;  %v385_v17 = vpack.c.bf16 %v3422_v55, %v3419_v2 }
 0x132   :  { %2734 = vmatprep.mubr.bf16.mxu1 %v385_v17  ;;  %v3491_v17 = vmul.f32 %v3477_v43, %v713_v62  ;;  %v696_v62 = vld [vmem:[%s4366_s2 + $0x8] sm:$0xff] }
 0x133   :  { %2735 = vmatmul.mubr.bf16.gmra.mrb[12].mxu1 %v386_v18  ;;  %v817_v18 = vrot.slane %v4368_v20, 1 }
 0x1ed   :  { %v2724_v11 = vpop.f32.mrb[0].mxu1 }
 0x1ee   :  { %v3439_v19 = vadd.f32 %v2724_v11, %v3436_v15  ;;  %v490_v21 = vpop.f32.mrb[1].mxu1 }
 0x1ef   :  { %v3442_v22 = vadd.f32 %v3436_v15, %v490_v21  ;;  %v2725_v23 = vpop.f32.mrb[2].mxu1  ;;  %v3495_v21 = vsel %vm692_vm1, 1.0, %v4368_v20 }
 0x1f0   :  { %v2407_v25 = vmul.f32 -1.442695, %v3439_v19  ;;  %v3446_v27 = vadd.f32 %v2725_v23, %v3436_v15  ;;  %v493_v29 = vpop.f32.mrb[3].mxu1 }
 0x1f1   :  { %v2405_v30 = vmul.f32 -1.442695, %v3442_v22  ;;  %v3450_v32 = vadd.f32 %v3436_v15, %v493_v29  ;;  %v1160_v29 = vsub.s32 7, %v3457_v45 }
 0x1f2   :  { %2993 = vpow2.f32 %v2407_v25  ;;  %v2408_v35 = vmul.f32 -1.442695, %v3446_v27  ;;  %v971_v25 = vsub.s32 4, %v3457_v45 }
 0x1f3   :  { %2995 = vpow2.f32 %v2405_v30  ;;  %v2406_v41 = vmul.f32 -1.442695, %v3450_v32  ;;  %v3500_v30 = vrot.slane %v695_v61, %v851_v14 }
 0x1f4   :  { %2997 = vpow2.f32 %v2408_v35  ;;  %v749_v35 = vmul.f32 %v3485_v10, %v3491_v17 }
 0x1f5   :  { %2999 = vpow2.f32 %v2406_v41  ;;  %v2728_v42 = vpop.f32.mrb[4].mxu1  ;;  %v3506_v41 = vmul.f32 %v3495_v21, %v817_v18 }
 0x1f6   :  { %v3455_v44 = vadd.f32 %v2728_v42, %v3436_v15  ;;  %v506_v31 = vpop.f32.mrb[5].mxu1  ;;  %v935_v42 = vsub.s32 3, %v3457_v45 }
 0x1f7   :  { %v3460_v47 = vadd.f32 %v3436_v15, %v506_v31  ;;  %v2729_v28 = vpop.f32.mrb[6].mxu1  ;;  %v1039_v31 = vsub.s32 5, %v3457_v45 }
 0x1f8   :  { %v509_v48 = vpop.f32.mrb[7].mxu1  ;;  %v2411_v34 = vmul.f32 -1.442695, %v3455_v44  ;;  %v3466_v26 = vadd.f32 %v2729_v28, %v3436_v15  ;;  %v3534_v14 = vrot.slane %v695_v61, %v935_v42  ;;  %v3548_v42 = vrot.slane %v696_v62, %v3469_v52 }
 0x1f9   :  { %v2409_v49 = vmul.f32 -1.442695, %v3460_v47  ;;  %v3480_v1 = vadd.f32 %v3436_v15, %v509_v48  ;;  %v3536_v18 = vrot.slane %v695_v61, %v1039_v31 }
 0x1fa   :  { %3001 = vpow2.f32 %v2411_v34  ;;  %v2412_v4 = vmul.f32 -1.442695, %v3466_v26  ;;  %v1124_v34 = vsub.s32 6, %v3457_v45 }
 0x1fb   :  { %3003 = vpow2.f32 %v2409_v49  ;;  %v2410_v23 = vmul.f32 -1.442695, %v3480_v1 }
 0x1fc   :  { %v2994_v50 = vpop.eup %2993 }
 0x1fd   :  { %v2996_v58 = vpop.eup %2995  ;;  %v603_v60 = vadd.f32 1.0, %v2994_v50 }
 0x1fe   :  { %v2998_v0 = vpop.eup %2997  ;;  %v601_v40 = vadd.f32 1.0, %v2996_v58  ;;  %v2732_v46 = vpop.f32.mrb[8].mxu1 }
 0x1ff   :  { %v3000_v38 = vpop.eup %2999  ;;  %3005 = vrcp.f32 %v603_v60  ;;  %v604_v3 = vadd.f32 1.0, %v2998_v0  ;;  %v522_v9 = vpop.f32.mrb[9].mxu1  ;;  %v3514_v49 = vadd.f32 %v2732_v46, %v3436_v15  ;;  %v3523_v0 = vrot.slane %v695_v61, %v971_v25 }
 0x200   :  { %3007 = vrcp.f32 %v601_v40  ;;  %v602_v13 = vadd.f32 1.0, %v3000_v38  ;;  %v2733_v63 = vpop.f32.mrb[10].mxu1  ;;  %v3525_v40 = vrot.slane %v695_v61, %v1160_v29  ;;  %v801_v38 = vadd.f32 %v785_v37, %v749_v35 }
 0x201   :  { %3009 = vrcp.f32 %v604_v3  ;;  %v525_v11 = vpop.f32.mrb[11].mxu1  ;;  %v853_v3 = vmul.f32 %v3500_v30, %v3506_v41  ;;  %v3538_v25 = vrot.slane %v695_v61, %v1124_v34  ;;  %v2415_v35 = vmul.f32 -1.442695, %v3514_v49 }
 0x202   :  { %3011 = vpow2.f32 %v2412_v4  ;;  %v3543_v37 = vadd.f32 %v3436_v15, %v522_v9 }
 0x203   :  { %3013 = vrcp.f32 %v602_v13  ;;  %v3550_v61 = vadd.f32 %v853_v3, %v801_v38  ;;  %v3567_v38 = vadd.f32 %v3436_v15, %v525_v11 }
 0x204   :  { %3015 = vpow2.f32 %v2410_v23  ;;  %v3002_v48 = vpop.eup %3001  ;;  %v2413_v62 = vmul.f32 -1.442695, %v3543_v37 }
 0x205   :  { %v3004_v56 = vpop.eup %3003  ;;  %v607_v23 = vadd.f32 1.0, %v3002_v48 }
 0x206   :  { %v3510_v28 = vpop.f32.mrb[12].mxu1  ;;  %v605_v31 = vadd.f32 1.0, %v3004_v56 }
 0x207   :  { %v3516_v50 = vpop.f32.mrb[13].mxu1  ;;  %3017 = vrcp.f32 %v607_v23 }
 0x208   :  { %v3518_v58 = vpop.f32.mrb[14].mxu1  ;;  %3019 = vpow2.f32 %v2415_v35 }
 0x209   :  { %v3006_v60 = vpop.eup %3005  ;;  %v3529_v46 = vpop.f32.mrb[15].mxu1  ;;  %3021 = vrcp.f32 %v605_v31 }
 0x20a   :  { %v3008_v4 = vpop.eup %3007  ;;  %v3532_v13 = vmul.f32 %v3006_v60, %v3439_v19 }
 0x20b   :  { %v3010_v20 = vpop.eup %3009  ;;  %v649_v29 = vmul.f32 %v3008_v4, %v3442_v22  ;;  %v3553_v22 = vadd.f32 %v2733_v63, %v3436_v15 }
 0x20c   :  { %v716_v55 = vrot.slane %v3532_v13, 7  ;;  %v820_v19 = vrot.slane %v3532_v13, 1  ;;  %v3012_v60 = vpop.eup %3011  ;;  %v3562_v59 = vmul.f32 %v3010_v20, %v3446_v27  ;;  %v788_v3 = vmul.f32 %v3487_v12, %v3532_v13 }
 0x20d   :  { %v714_v48 = vrot.slane %v649_v29, 7  ;;  %v818_v2 = vrot.slane %v649_v29, 1  ;;  %v3014_v34 = vpop.eup %3013  ;;  %v786_v27 = vmul.f32 %v3487_v12, %v649_v29  ;;  %v2416_v5 = vmul.f32 -1.442695, %v3553_v22 }
 0x20e   :  { %v3556_v9 = vmul.f32 %v3477_v43, %v716_v55  ;;  %v3559_v4 = vmul.f32 %v3495_v21, %v820_v19  ;;  %v3016_v63 = vpop.eup %3015  ;;  %v608_v19 = vadd.f32 1.0, %v3012_v60  ;;  %v650_v35 = vmul.f32 %v3014_v34, %v3450_v32 }
 0x20f   :  { %v730_v56 = vmul.f32 %v3477_v43, %v714_v48  ;;  %v834_v23 = vmul.f32 %v3495_v21, %v818_v2  ;;  %v717_v7 = vrot.slane %v3562_v59, 7  ;;  %v821_v31 = vrot.slane %v3562_v59, 1 }
 0x210   :  { %v752_v55 = vmul.f32 %v3485_v10, %v3556_v9  ;;  %v856_v11 = vmul.f32 %v3500_v30, %v3559_v4  ;;  %v606_v60 = vadd.f32 1.0, %v3016_v63  ;;  %v973_v2 = vmul.f32 %v3523_v0, %v649_v29 }
 0x211   :  { %v750_v20 = vmul.f32 %v3485_v10, %v730_v56  ;;  %v937_v16 = vmul.f32 %v3534_v14, %v730_v56  ;;  %v3586_v32 = vmul.f32 %v3477_v43, %v717_v7  ;;  %v854_v34 = vmul.f32 %v3500_v30, %v834_v23 }
 0x212   :  { %v804_v48 = vadd.f32 %v788_v3, %v752_v55  ;;  %v3590_v56 = vmul.f32 %v3495_v21, %v821_v31  ;;  %v715_v55 = vrot.slane %v650_v35, 7  ;;  %3023 = vrcp.f32 %v608_v19 }
 0x213   :  { %v802_v6 = vadd.f32 %v786_v27, %v750_v20  ;;  %v953_v54 = vadd.f32 %v937_v16, %v3550_v61  ;;  %v1041_v63 = vmul.f32 %v3536_v18, %v834_v23  ;;  %v940_v20 = vmul.f32 %v3534_v14, %v3586_v32  ;;  %v3018_v27 = vpop.eup %3017 }
 0x214   :  { %v872_v8 = vadd.f32 %v856_v11, %v804_v48  ;;  %3025 = vpow2.f32 %v2413_v62  ;;  %v976_v29 = vmul.f32 %v3523_v0, %v3562_v59  ;;  %v731_v7 = vmul.f32 %v3477_v43, %v715_v55 }
 0x215   :  { %v989_v3 = vadd.f32 %v973_v2, %v953_v54  ;;  %v870_v16 = vadd.f32 %v854_v34, %v802_v6  ;;  %3027 = vrcp.f32 %v606_v60  ;;  %v787_v31 = vmul.f32 %v3487_v12, %v650_v35  ;;  %v3599_v54 = vpop.eup %3019 }
 0x216   :  { %v956_v11 = vadd.f32 %v940_v20, %v872_v8  ;;  %v819_v19 = vrot.slane %v650_v35, 1  ;;  %v1044_v23 = vmul.f32 %v3536_v18, %v3590_v56  ;;  %v751_v62 = vmul.f32 %v3485_v10, %v731_v7  ;;  %v3022_v34 = vpop.eup %3021 }
 0x217   :  { %v1057_v48 = vadd.f32 %v1041_v63, %v989_v3  ;;  %v938_v6 = vmul.f32 %v3534_v14, %v731_v7  ;;  %v1126_v2 = vmul.f32 %v3538_v25, %v731_v7  ;;  %v974_v8 = vmul.f32 %v3523_v0, %v650_v35 }
 0x218   :  { %v992_v55 = vadd.f32 %v976_v29, %v956_v11  ;;  %v835_v60 = vmul.f32 %v3495_v21, %v819_v19  ;;  %v1162_v3 = vmul.f32 %v3525_v40, %v650_v35  ;;  %v803_v63 = vadd.f32 %v787_v31, %v751_v62 }
 0x219   :  { %v954_v20 = vadd.f32 %v938_v6, %v870_v16  ;;  %v1142_v53 = vadd.f32 %v1126_v2, %v1057_v48  ;;  %v3610_v51 = vmul.f32 %v3018_v27, %v3455_v44  ;;  %3029 = vpow2.f32 %v2416_v5 }
 0x21a   :  { %v3612_v57 = vadd.f32 %v1044_v23, %v992_v55  ;;  %v855_v24 = vmul.f32 %v3500_v30, %v835_v60  ;;  %v1042_v7 = vmul.f32 %v3536_v18, %v835_v60  ;;  %v1230_v19 = vmul.f32 %v3548_v42, %v835_v60 }
 0x21b   :  { %v990_v29 = vadd.f32 %v974_v8, %v954_v20  ;;  %v1178_v11 = vadd.f32 %v1162_v3, %v1142_v53  ;;  %v720_v36 = vrot.slane %v3610_v51, 7  ;;  %v939_v35 = vmul.f32 %v3534_v14, %v3556_v9  ;;  %v2889_v8 = vld [vmem:[%s4364_s3 + $0x40] sm:$0xff]  }
 0x21c   :  { %v1127_v44 = vmul.f32 %v3538_v25, %v3556_v9  ;;  %v753_v16 = vmul.f32 %v3485_v10, %v3586_v32  ;;  %v871_v27 = vadd.f32 %v855_v24, %v803_v63  ;;  %v3024_v48 = vpop.eup %3023  ;;  %v653_v5 = vmul.f32 %v3022_v34, %v3460_v47  ;;  %2739 = vmatpush3.bf16.msra.mxu0 %v2889_v8 }
 0x21d   :  { %v1058_v31 = vadd.f32 %v1042_v7, %v990_v29  ;;  %v3624_v23 = vadd.f32 %v1230_v19, %v1178_v11  ;;  %v3627_v53 = vmul.f32 %v3477_v43, %v720_v36  ;;  %v975_v6 = vmul.f32 %v3523_v0, %v3532_v13  ;;  %v2890_v19 = vld [vmem:[%s4364_s3 + $0x48] sm:$0xff]  }
 0x21e   :  { %v3630_v62 = vpop.eup %3025  ;;  %v955_v2 = vadd.f32 %v939_v35, %v871_v27  ;;  %v824_v9 = vrot.slane %v3610_v51, 1  ;;  %v3637_v24 = vadd.f32 %v3510_v28, %v3436_v15  ;;  %v1043_v60 = vmul.f32 %v3536_v18, %v3559_v4 }
 0x21f   :  { %v3028_v55 = vpop.eup %3027  ;;  %v1163_v36 = vmul.f32 %v3525_v40, %v3532_v13  ;;  %v789_v47 = vmul.f32 %v3487_v12, %v3562_v59  ;;  %v1143_v34 = vadd.f32 %v1127_v44, %v1058_v31  ;;  %v1231_v3 = vmul.f32 %v3548_v42, %v3559_v4 }
 0x220   :  { %v991_v28 = vadd.f32 %v975_v6, %v955_v2  ;;  %v756_v63 = vmul.f32 %v3485_v10, %v3627_v53  ;;  %v3653_v20 = vmul.f32 %v3024_v48, %v3466_v26  ;;  %v1128_v13 = vmul.f32 %v3538_v25, %v3586_v32 }
 0x221   :  { %v805_v7 = vadd.f32 %v789_v47, %v753_v16  ;;  %v1179_v29 = vadd.f32 %v1163_v36, %v1143_v34  ;;  %v718_v11 = vrot.slane %v653_v5, 7  ;;  %v792_v4 = vmul.f32 %v3487_v12, %v3610_v51 }
 0x222   :  { %v1059_v35 = vadd.f32 %v1043_v60, %v991_v28  ;;  %v3663_v44 = vmul.f32 %v3495_v21, %v824_v9  ;;  %v822_v26 = vrot.slane %v653_v5, 1  ;;  %v4405_v27 = vmov 0.0  }
 0x223   :  { %2740 = vmatprep.subr.bf16.mxu0 %v4405_v27  ;;  %v857_v32 = vmul.f32 %v3500_v30, %v3590_v56  ;;  %v1164_v16 = vmul.f32 %v3525_v40, %v3562_v59  ;;  %v3670_v48 = vadd.f32 %v1231_v3, %v1179_v29  ;;  %v734_v31 = vmul.f32 %v3477_v43, %v718_v11  ;;  %v3673_v6 = vpop.eup %3029  ;;  %v2891_v3 = vld [vmem:[%s4364_s3 + $0x50] sm:$0xff]  }
 0x224   :  { %v1232_v2 = vmul.f32 %v3548_v42, %v3590_v56  ;;  %v1144_v9 = vadd.f32 %v1128_v13, %v1059_v35  ;;  %v808_v60 = vadd.f32 %v792_v4, %v756_v63  ;;  %v908_v36 = vrot.slane %v3653_v20, 7  ;;  %2741 = vmatpush3.bf16.msra.mxu0 %v2890_v19  ;;  %2754 = vmatprep.mubr.msk.bf16.mxu0 %vm3194_vm2, %v4405_v27 }
 0x225   :  { %v873_v47 = vadd.f32 %v857_v32, %v805_v7  ;;  %v838_v34 = vmul.f32 %v3495_v21, %v822_v26  ;;  %v941_v8 = vmul.f32 %v3534_v14, %v734_v31  ;;  %v1129_v59 = vmul.f32 %v3538_v25, %v734_v31  ;;  %2742 = vmatprep.subr.bf16.mxu0 %v4405_v27 }
 0x226   :  { %v1180_v28 = vadd.f32 %v1164_v16, %v1144_v9  ;;  %v754_v29 = vmul.f32 %v3485_v10, %v734_v31  ;;  %v860_v56 = vmul.f32 %v3500_v30, %v3663_v44  ;;  %v654_v63 = vmul.f32 %v3028_v55, %v3480_v1  ;;  %2774 = vmatprep.mubr.msk.bf16.mxu1 %vm3194_vm2, %v4405_v27 }
 0x227   :  { %v957_v7 = vadd.f32 %v941_v8, %v873_v47  ;;  %v977_v13 = vmul.f32 %v3523_v0, %v653_v5  ;;  %v1145_v11 = vadd.f32 %v1129_v59, %v3612_v57  ;;  %v1165_v19 = vmul.f32 %v3525_v40, %v653_v5  ;;  %v2892_v57 = vld [vmem:[%s4364_s3 + $0x58] sm:$0xff]  }
 0x228   :  { %v3692_v35 = vadd.f32 %v1232_v2, %v1180_v28  ;;  %v790_v4 = vmul.f32 %v3487_v12, %v653_v5  ;;  %v876_v26 = vadd.f32 %v860_v56, %v808_v60  ;;  %v3696_v32 = vmul.f32 %v3477_v43, %v908_v36  ;;  %2743 = vmatpush3.bf16.msra.mxu0 %v2891_v3 }
 0x229   :  { %v993_v16 = vadd.f32 %v977_v13, %v957_v7  ;;  %v1045_v1 = vmul.f32 %v3536_v18, %v838_v34  ;;  %v1181_v55 = vadd.f32 %v1165_v19, %v1145_v11  ;;  %v1233_v31 = vmul.f32 %v3548_v42, %v838_v34  ;;  %2744 = vmatprep.subr.bf16.mxu0 %v4405_v27  ;;  %v2893_v11 = vld [vmem:[%s4364_s3 + $0x60] sm:$0xff]  }
 0x22a   :  { %v806_v9 = vadd.f32 %v790_v4, %v754_v29  ;;  %v944_v2 = vmul.f32 %v3534_v14, %v3696_v32  ;;  %v1012_v5 = vrot.slane %v3653_v20, 1  ;;  %v2414_v60 = vmul.f32 -1.442695, %v3567_v38 }
 0x22b   :  { %v1061_v36 = vadd.f32 %v1045_v1, %v993_v16  ;;  %v3708_v47 = vadd.f32 %v1233_v31, %v1181_v55  ;;  %v719_v8 = vrot.slane %v654_v63, 7  ;;  %v858_v59 = vmul.f32 %v3500_v30, %v838_v34  ;;  %v3724_v34 = vld [vmem:[%s4365_s4 + $0x7] ss:$0 sm:$0xff] }
 0x22c   :  { %v960_v3 = vadd.f32 %v944_v2, %v876_v26  ;;  %v980_v28 = vmul.f32 %v3523_v0, %v3653_v20  ;;  %v3714_v29 = vmul.f32 %v3495_v21, %v1012_v5  ;;  %v823_v7 = vrot.slane %v654_v63, 1  ;;  %2745 = vmatpush3.bf16.msra.mxu0 %v2892_v57 }
 0x22d   :  { %v735_v56 = vmul.f32 %v3477_v43, %v719_v8  ;;  %v2419_v13 = vmul.f32 -1.442695, %v3637_v24  ;;  %v874_v19 = vadd.f32 %v858_v59, %v806_v9  ;;  %3031 = vpow2.f32 %v2414_v60  ;;  %2746 = vmatprep.subr.bf16.mxu0 %v4405_v27  ;;  %v2894_v59 = vld [vmem:[%s4364_s3 + $0x68] sm:$0xff]  }
 0x22e   :  { %v996_v4 = vadd.f32 %v980_v28, %v960_v3  ;;  %v1048_v26 = vmul.f32 %v3536_v18, %v3714_v29  ;;  %v791_v1 = vmul.f32 %v3487_v12, %v654_v63  ;;  %v839_v55 = vmul.f32 %v3495_v21, %v823_v7 }
 0x22f   :  { %v755_v16 = vmul.f32 %v3485_v10, %v735_v56  ;;  %v611_v31 = vadd.f32 1.0, %v3599_v54  ;;  %v942_v2 = vmul.f32 %v3534_v14, %v735_v56  ;;  %v1130_v9 = vmul.f32 %v3538_v25, %v735_v56 }
 0x230   :  { %v3733_v57 = vadd.f32 %v1048_v26, %v996_v4  ;;  %v3739_v5 = vadd.f32 %v3724_v34, %v3624_v23  ;;  %v859_v8 = vmul.f32 %v3500_v30, %v839_v55  ;;  %3033 = vpow2.f32 %v2419_v13  ;;  %2747 = vmatpush3.bf16.msra.mxu0 %v2893_v11 }
 0x231   :  { %v807_v60 = vadd.f32 %v791_v1, %v755_v16  ;;  %v958_v54 = vadd.f32 %v942_v2, %v874_v19  ;;  %v978_v3 = vmul.f32 %v3523_v0, %v654_v63  ;;  %v1146_v28 = vadd.f32 %v1130_v9, %v1061_v36  ;;  %2748 = vmatprep.subr.bf16.mxu0 %v4405_v27  ;;  %v2895_v1 = vld [vmem:[%s4364_s3 + $0x70] sm:$0xff]  }
 0x232   :  { %v1166_v7 = vmul.f32 %v3525_v40, %v654_v63  ;;  %v943_v23 = vmul.f32 %v3534_v14, %v3627_v53  ;;  %3035 = vrcp.f32 %v611_v31  ;;  %v609_v13 = vadd.f32 1.0, %v3630_v62 }
 0x233   :  { %v875_v56 = vadd.f32 %v859_v8, %v807_v60  ;;  %v994_v11 = vadd.f32 %v978_v3, %v958_v54  ;;  %v1046_v4 = vmul.f32 %v3536_v18, %v839_v55  ;;  %v1234_v19 = vmul.f32 %v3548_v42, %v839_v55 }
 0x234   :  { %v1182_v26 = vadd.f32 %v1166_v7, %v1146_v28  ;;  %v979_v36 = vmul.f32 %v3523_v0, %v3610_v51  ;;  %3037 = vrcp.f32 %v609_v13  ;;  %v612_v63 = vadd.f32 1.0, %v3673_v6  ;;  %2749 = vmatpush3.bf16.msra.mxu0 %v2894_v59  ;;  %v2896_v28 = vld [vmem:[%s4364_s3 + $0x78] sm:$0xff]  }
 0x235   :  { %v959_v16 = vadd.f32 %v943_v23, %v875_v56  ;;  %v1047_v62 = vmul.f32 %v3536_v18, %v3663_v44  ;;  %v1131_v31 = vmul.f32 %v3538_v25, %v3627_v53  ;;  %v1062_v2 = vadd.f32 %v1046_v4, %v994_v11  ;;  %2750 = vmatprep.subr.bf16.mxu0 %v4405_v27 }
 0x236   :  { %v3763_v55 = vadd.f32 %v1234_v19, %v1182_v26  ;;  %v3768_v9 = vadd.f32 %v3724_v34, %v3670_v48  ;;  %v2424_v6 = vmul.f32 -1.442695, %v3739_v5  ;;  %3039 = vrcp.f32 %v612_v63 }
 0x237   :  { %v995_v60 = vadd.f32 %v979_v36, %v959_v16  ;;  %v3032_v8 = vpop.eup %3031  ;;  %v1167_v59 = vmul.f32 %v3525_v40, %v3610_v51  ;;  %v1147_v54 = vadd.f32 %v1131_v31, %v1062_v2  ;;  %v1132_v53 = vmul.f32 %v3538_v25, %v3696_v32 }
 0x238   :  { %2751 = vmatpush3.bf16.msra.mxu0 %v2895_v1  ;;  %v1235_v48 = vmul.f32 %v3548_v42, %v3663_v44  ;;  %3041 = vpow2.f32 %v2424_v6  ;;  %v2425_v32 = vmul.f32 -1.442695, %v3768_v9  ;;  %v1168_v23 = vmul.f32 %v3525_v40, %v3653_v20 }
 0x239   :  { %v1063_v3 = vadd.f32 %v1047_v62, %v995_v60  ;;  %v1183_v7 = vadd.f32 %v1167_v59, %v1147_v54  ;;  %2752 = vmatprep.subr.bf16.mxu0 %v4405_v27  ;;  %v610_v44 = vadd.f32 1.0, %v3032_v8  ;;  %v1236_v4 = vmul.f32 %v3548_v42, %v3714_v29 }
 0x23a   :  { %v3034_v51 = vpop.eup %3033  ;;  %3043 = vpow2.f32 %v2425_v32  ;;  %v3797_v20 = vadd.f32 %v3724_v34, %v3692_v35  ;;  %v3810_v31 = vmul.f32 %v3538_v25, %v3491_v17 }
 0x23b   :  { %v1148_v56 = vadd.f32 %v1132_v53, %v1063_v3  ;;  %v3788_v13 = vadd.f32 %v1235_v48, %v1183_v7  ;;  %3045 = vrcp.f32 %v610_v44  ;;  %v615_v59 = vadd.f32 1.0, %v3034_v51 }
 0x23c   :  { %v3036_v11 = vpop.eup %3035  ;;  %2753 = vmatpush3.bf16.msra.mxu0 %v2896_v28  ;;  %v2426_v6 = vmul.f32 -1.442695, %v3797_v20  ;;  %v3835_v53 = vmul.f32 0.0, %v3525_v40  ;;  %v1149_v28 = vadd.f32 %v3810_v31, %v3733_v57  ;;  %v3843_v48 = vmul.f32 %v3548_v42, %v3506_v41 }
 0x23d   :  { %v1184_v26 = vadd.f32 %v1168_v23, %v1148_v56  ;;  %v3793_v19 = vmul.f32 %v3036_v11, %v3514_v49  ;;  %v3806_v49 = vadd.f32 %v3436_v15, %v3516_v50  ;;  %v3852_v57 = vadd.f32 %v3436_v15, %v3529_v46 }
 0x23e   :  { %v3038_v36 = vpop.eup %3037  ;;  %3047 = vpow2.f32 %v2426_v6 }
 0x23f   :  { %v3799_v16 = vadd.f32 %v1236_v4, %v1184_v26  ;;  %v724_v63 = vrot.slane %v3793_v19, 7  ;;  %v828_v1 = vrot.slane %v3793_v19, 1  ;;  %v657_v29 = vmul.f32 %v3038_v36, %v3543_v37 }
 0x240   :  { %v3040_v62 = vpop.eup %3039  ;;  %v3821_v37 = vadd.f32 %v3518_v58, %v3436_v15  ;;  %v796_v17 = vmul.f32 %v3487_v12, %v3793_v19  ;;  %v2417_v3 = vmul.f32 -1.442695, %v3806_v49  ;;  %3049 = vrcp.f32 %v615_v59 }
 0x241   :  { %v3813_v35 = vmul.f32 %v3477_v43, %v724_v63  ;;  %v3816_v2 = vmul.f32 %v3040_v62, %v3553_v22  ;;  %v722_v60 = vrot.slane %v657_v29, 7  ;;  %v3828_v8 = vmul.f32 %v3495_v21, %v828_v1 }
 0x242   :  { %v3042_v54 = vpop.eup %3041  ;;  %v3832_v22 = vadd.f32 %v3724_v34, %v3708_v47  ;;  %v826_v47 = vrot.slane %v657_v29, 1  ;;  %v2420_v23 = vmul.f32 -1.442695, %v3821_v37  ;;  %3051 = vpow2.f32 %v2417_v3 }
 0x243   :  { %v760_v50 = vmul.f32 %v3485_v10, %v3813_v35  ;;  %v738_v58 = vmul.f32 %v3477_v43, %v722_v60  ;;  %v725_v51 = vrot.slane %v3816_v2, 7  ;;  %v1331_v56 = vadd.f32 1.0, %v3042_v54 }
 0x244   :  { %v864_v44 = vmul.f32 %v3500_v30, %v3828_v8  ;;  %v3044_v41 = vpop.eup %3043  ;;  %v2427_v11 = vmul.f32 -1.442695, %v3832_v22  ;;  %v1185_v63 = vadd.f32 %v3835_v53, %v1149_v28  ;;  %v829_v6 = vrot.slane %v3816_v2, 1 }
 0x245   :  { %v812_v7 = vadd.f32 %v796_v17, %v760_v50  ;;  %v945_v32 = vmul.f32 %v3534_v14, %v738_v58  ;;  %v758_v4 = vmul.f32 %v3485_v10, %v738_v58  ;;  %v3046_v36 = vpop.eup %3045  ;;  %v3859_v62 = vmul.f32 %v3477_v43, %v725_v51 }
 0x246   :  { %v794_v15 = vmul.f32 %v3487_v12, %v657_v29  ;;  %v842_v46 = vmul.f32 %v3495_v21, %v826_v47  ;;  %v981_v60 = vmul.f32 %v3523_v0, %v657_v29  ;;  %3053 = vpow2.f32 %v2420_v23 }
 0x247   :  { %v961_v26 = vadd.f32 %v945_v32, %v3550_v61  ;;  %v880_v1 = vadd.f32 %v864_v44, %v812_v7  ;;  %3055 = vrcp.f32 %v1331_v56  ;;  %v3866_v61 = vmul.f32 %v3495_v21, %v829_v6 }
 0x248   :  { %v948_v50 = vmul.f32 %v3534_v14, %v3859_v62  ;;  %v1332_v17 = vadd.f32 1.0, %v3044_v41  ;;  %v810_v59 = vadd.f32 %v794_v15, %v758_v4  ;;  %v658_v58 = vmul.f32 %v3046_v36, %v3567_v38  ;;  %v3048_v41 = vpop.eup %3047 }
 0x249   :  { %v997_v54 = vadd.f32 %v981_v60, %v961_v26  ;;  %v1253_v3 = vadd.f32 %v3843_v48, %v1185_v63  ;;  %v984_v7 = vmul.f32 %v3523_v0, %v3816_v2  ;;  %v2418_v29 = vmul.f32 -1.442695, %v3852_v57 }
 0x24a   :  { %v964_v28 = vadd.f32 %v948_v50, %v880_v1  ;;  %3057 = vpow2.f32 %v2427_v11  ;;  %v862_v51 = vmul.f32 %v3500_v30, %v842_v46  ;;  %v1049_v47 = vmul.f32 %v3536_v18, %v842_v46  ;;  %v3050_v36 = vpop.eup %3049 }
 0x24b   :  { %v723_v32 = vrot.slane %v658_v58, 7  ;;  %v3879_v23 = vadd.f32 %v3724_v34, %v3763_v55  ;;  %v1052_v38 = vmul.f32 %v3536_v18, %v3866_v61  ;;  %v827_v44 = vrot.slane %v658_v58, 1 }
 0x24c   :  { %v1000_v56 = vadd.f32 %v984_v7, %v964_v28  ;;  %3059 = vrcp.f32 %v1332_v17  ;;  %v878_v4 = vadd.f32 %v862_v51, %v810_v59  ;;  %v1065_v26 = vadd.f32 %v1049_v47, %v997_v54  ;;  %v3052_v6 = vpop.eup %3051 }
 0x24d   :  { %v739_v11 = vmul.f32 %v3477_v43, %v723_v32  ;;  %v3885_v63 = vadd.f32 %v3724_v34, %v1253_v3  ;;  %v843_v55 = vmul.f32 %v3495_v21, %v827_v44  ;;  %3061 = vpow2.f32 %v2418_v29 }
 0x24e   :  { %v3887_v1 = vadd.f32 %v1052_v38, %v1000_v56  ;;  %v795_v46 = vmul.f32 %v3487_v12, %v658_v58  ;;  %v1333_v17 = vadd.f32 1.0, %v3048_v41  ;;  %v2428_v59 = vmul.f32 -1.442695, %v3879_v23 }
 0x24f   :  { %v759_v15 = vmul.f32 %v3485_v10, %v739_v11  ;;  %v946_v60 = vmul.f32 %v3534_v14, %v739_v11  ;;  %v1134_v50 = vmul.f32 %v3538_v25, %v739_v11  ;;  %v982_v54 = vmul.f32 %v3523_v0, %v658_v58 }
 0x250   :  { %v1170_v3 = vmul.f32 %v3525_v40, %v658_v58  ;;  %v3054_v28 = vpop.eup %3053  ;;  %v863_v29 = vmul.f32 %v3500_v30, %v843_v55  ;;  %v947_v56 = vmul.f32 %v3534_v14, %v3813_v35  ;;  %v1050_v38 = vmul.f32 %v3536_v18, %v843_v55 }
 0x251   :  { %v811_v7 = vadd.f32 %v795_v46, %v759_v15  ;;  %v962_v51 = vadd.f32 %v946_v60, %v878_v4  ;;  %v1150_v47 = vadd.f32 %v1134_v50, %v1065_v26  ;;  %v3056_v32 = vpop.eup %3055  ;;  %v3902_v44 = vmul.f32 %v3050_v36, %v3637_v24 }
 0x252   :  { %v613_v41 = vadd.f32 1.0, %v3052_v6  ;;  %v1238_v58 = vmul.f32 %v3548_v42, %v843_v55  ;;  %3063 = vrcp.f32 %v1333_v17  ;;  %v983_v4 = vmul.f32 %v3523_v0, %v3793_v19 }
 0x253   :  { %v879_v11 = vadd.f32 %v863_v29, %v811_v7  ;;  %v998_v33 = vadd.f32 %v982_v54, %v962_v51  ;;  %v1186_v39 = vadd.f32 %v1170_v3, %v1150_v47  ;;  %v616_v26 = vadd.f32 1.0, %v3054_v28 }
 0x254   :  { %v3058_v15 = vpop.eup %3057  ;;  %v1135_v46 = vmul.f32 %v3538_v25, %v3813_v35  ;;  %v2431_v24 = vmul.f32 -1.442695, %v3885_v63  ;;  %3065 = vpow2.f32 %v2428_v59  ;;  %v1051_v36 = vmul.f32 %v3536_v18, %v3828_v8 }
 0x255   :  { %v963_v60 = vadd.f32 %v947_v56, %v879_v11  ;;  %v1066_v50 = vadd.f32 %v1050_v38, %v998_v33  ;;  %v1254_v52 = vadd.f32 %v1238_v58, %v1186_v39  ;;  %v1171_v55 = vmul.f32 %v3525_v40, %v3793_v19 }
 0x256   :  { %v3060_v6 = vpop.eup %3059  ;;  %v728_v3 = vrot.slane %v3902_v44, 7  ;;  %3067 = vrcp.f32 %v613_v41  ;;  %v3917_v33 = vadd.f32 %v3724_v34, %v3788_v13  ;;  %v1239_v39 = vmul.f32 %v3548_v42, %v3828_v8 }
 0x257   :  { %v999_v17 = vadd.f32 %v983_v4, %v963_v60  ;;  %v1151_v54 = vadd.f32 %v1135_v46, %v1066_v50  ;;  %v3062_v28 = vpop.eup %3061  ;;  %3069 = vrcp.f32 %v616_v26  ;;  %v1136_v35 = vmul.f32 %v3538_v25, %v3859_v62 }
 0x258   :  { %v614_v7 = vadd.f32 1.0, %v3062_v28  ;;  %v1334_v29 = vadd.f32 1.0, %v3058_v15  ;;  %3071 = vpow2.f32 %v2431_v24  ;;  %v1172_v51 = vmul.f32 %v3525_v40, %v3816_v2 }
 0x259   :  { %v1067_v59 = vadd.f32 %v1051_v36, %v999_v17  ;;  %v1187_v19 = vadd.f32 %v1171_v55, %v1151_v54  ;;  %v3926_v13 = vmul.f32 %v3477_v43, %v728_v3  ;;  %v2429_v38 = vmul.f32 -1.442695, %v3917_v33 }
 0x25a   :  { %v761_v8 = vmul.f32 %v3485_v10, %v3859_v62  ;;  %3073 = vrcp.f32 %v614_v7  ;;  %v1240_v41 = vmul.f32 %v3548_v42, %v3866_v61  ;;  %v3934_v58 = vadd.f32 %v3724_v34, %v1254_v52 }
 0x25b   :  { %v1152_v47 = vadd.f32 %v1136_v35, %v1067_v59  ;;  %v1255_v56 = vadd.f32 %v1239_v39, %v1187_v19  ;;  %v832_v4 = vrot.slane %v3902_v44, 1  ;;  %v3938_v15 = vmul.f32 %v3060_v6, %v3768_v9 }
 0x25c   :  { %v3064_v26 = vpop.eup %3063  ;;  %3075 = vrcp.f32 %v1334_v29  ;;  %v3942_v46 = vadd.f32 %v3724_v34, %v3799_v16  ;;  %v797_v62 = vmul.f32 %v3487_v12, %v3816_v2  ;;  %v764_v52 = vmul.f32 %v3485_v10, %v3926_v13 }
 0x25d   :  { %v1188_v11 = vadd.f32 %v1172_v51, %v1152_v47  ;;  %v3947_v50 = vadd.f32 %v3724_v34, %v1255_v56  ;;  %v3952_v36 = vmul.f32 %v3056_v32, %v3739_v5  ;;  %3077 = vpow2.f32 %v2429_v38 }
 0x25e   :  { %v3066_v24 = vpop.eup %3065  ;;  %v813_v55 = vadd.f32 %v797_v62, %v761_v8  ;;  %v2432_v16 = vmul.f32 -1.442695, %v3934_v58  ;;  %v800_v6 = vmul.f32 %v3487_v12, %v3902_v44  ;;  %v3958_v2 = vmul.f32 %v3495_v21, %v832_v4 }
 0x25f   :  { %v1256_v60 = vadd.f32 %v1240_v41, %v1188_v11  ;;  %v3962_v54 = vadd.f32 %v3938_v15, %v3952_v36  ;;  %v3965_v3 = vmul.f32 %v3064_v26, %v3797_v20  ;;  %v2430_v32 = vmul.f32 -1.442695, %v3942_v46 }
 0x260   :  { %v3068_v9 = vpop.eup %3067  ;;  %v865_v28 = vmul.f32 %v3500_v30, %v3866_v61  ;;  %v2433_v39 = vmul.f32 -1.442695, %v3947_v50  ;;  %v816_v35 = vadd.f32 %v800_v6, %v764_v52  ;;  %v1335_v7 = vadd.f32 1.0, %v3066_v24 }
 0x261   :  { %v3070_v17 = vpop.eup %3069  ;;  %v661_v5 = vmul.f32 %v3068_v9, %v3806_v49  ;;  %v3978_v20 = vadd.f32 %v3724_v34, %v1256_v60  ;;  %3079 = vpow2.f32 %v2432_v16  ;;  %v868_v47 = vmul.f32 %v3500_v30, %v3958_v2 }
 0x262   :  { %v3973_v59 = vmul.f32 %v3070_v17, %v3821_v37  ;;  %v3975_v19 = vpop.eup %3071  ;;  %v881_v49 = vadd.f32 %v865_v28, %v813_v55  ;;  %3081 = vpow2.f32 %v2430_v32 }
 0x263   :  { %v726_v29 = vrot.slane %v661_v5, 7  ;;  %v830_v51 = vrot.slane %v661_v5, 1  ;;  %3083 = vpow2.f32 %v2433_v39  ;;  %v884_v41 = vadd.f32 %v868_v47, %v816_v35 }
 0x264   :  { %v916_v61 = vrot.slane %v3973_v59, 7  ;;  %v3074_v56 = vpop.eup %3073  ;;  %v1020_v8 = vrot.slane %v3973_v59, 1  ;;  %v798_v60 = vmul.f32 %v3487_v12, %v661_v5  ;;  %v2434_v24 = vmul.f32 -1.442695, %v3978_v20 }
 0x265   :  { %v742_v38 = vmul.f32 %v3477_v43, %v726_v29  ;;  %v846_v37 = vmul.f32 %v3495_v21, %v830_v51  ;;  %v662_v4 = vmul.f32 %v3074_v56, %v3852_v57  ;;  %v985_v9 = vmul.f32 %v3523_v0, %v661_v5 }
 0x266   :  { %v3987_v11 = vmul.f32 %v3477_v43, %v916_v61  ;;  %v3990_v26 = vpop.eup %3075  ;;  %v1173_v16 = vmul.f32 %v3525_v40, %v661_v5  ;;  %v4003_v39 = vmul.f32 %v3495_v21, %v1020_v8  ;;  %v988_v51 = vmul.f32 %v3523_v0, %v3973_v59 }
 0x267   :  { %v762_v62 = vmul.f32 %v3485_v10, %v742_v38  ;;  %v949_v52 = vmul.f32 %v3534_v14, %v742_v38  ;;  %v1137_v55 = vmul.f32 %v3538_v25, %v742_v38  ;;  %v3078_v57 = vpop.eup %3077  ;;  %v866_v32 = vmul.f32 %v3500_v30, %v846_v37 }
 0x268   :  { %v952_v6 = vmul.f32 %v3534_v14, %v3987_v11  ;;  %v727_v47 = vrot.slane %v662_v4, 7  ;;  %v1053_v56 = vmul.f32 %v3536_v18, %v846_v37  ;;  %v1241_v38 = vmul.f32 %v3548_v42, %v846_v37 }
 0x269   :  { %v814_v17 = vadd.f32 %v798_v60, %v762_v62  ;;  %v965_v28 = vadd.f32 %v949_v52, %v881_v49  ;;  %v1153_v35 = vadd.f32 %v1137_v55, %v3887_v1  ;;  %v1056_v49 = vmul.f32 %v3536_v18, %v4003_v39 }
 0x26a   :  { %v968_v29 = vadd.f32 %v952_v6, %v884_v41  ;;  %v743_v8 = vmul.f32 %v3477_v43, %v727_v47  ;;  %3085 = vpow2.f32 %v2434_v24  ;;  %v799_v1 = vmul.f32 %v3487_v12, %v662_v4 }
 0x26b   :  { %v882_v61 = vadd.f32 %v866_v32, %v814_v17  ;;  %v1001_v5 = vadd.f32 %v985_v9, %v965_v28  ;;  %v1189_v62 = vadd.f32 %v1173_v16, %v1153_v35  ;;  %v831_v41 = vrot.slane %v662_v4, 1  ;;  %v3080_v55 = vpop.eup %3079 }
 0x26c   :  { %v1004_v60 = vadd.f32 %v988_v51, %v968_v29  ;;  %v763_v9 = vmul.f32 %v3485_v10, %v743_v8  ;;  %v950_v32 = vmul.f32 %v3534_v14, %v743_v8  ;;  %v3082_v37 = vpop.eup %3081  ;;  %3087 = vrcp.f32 %v1335_v7 }
 0x26d   :  { %v1069_v52 = vadd.f32 %v1053_v56, %v1001_v5  ;;  %v1257_v6 = vadd.f32 %v1241_v38, %v1189_v62  ;;  %v847_v16 = vmul.f32 %v3495_v21, %v831_v41  ;;  %v986_v28 = vmul.f32 %v3523_v0, %v662_v4  ;;  %v3084_v35 = vpop.eup %3083 }
 0x26e   :  { %v1072_v17 = vadd.f32 %v1056_v49, %v1004_v60  ;;  %v1138_v43 = vmul.f32 %v3538_v25, %v743_v8  ;;  %v815_v29 = vadd.f32 %v799_v1, %v763_v9  ;;  %v966_v51 = vadd.f32 %v950_v32, %v882_v61 }
 0x26f   :  { %v4020_v24 = vadd.f32 %v3724_v34, %v1257_v6  ;;  %v1336_v47 = vadd.f32 1.0, %v3078_v57  ;;  %v867_v10 = vmul.f32 %v3500_v30, %v847_v16  ;;  %v1174_v7 = vmul.f32 %v3525_v40, %v662_v4 }
 0x270   :  { %v1157_v12 = vadd.f32 %v3810_v31, %v1072_v17  ;;  %v1154_v5 = vadd.f32 %v1138_v43, %v1069_v52  ;;  %v1002_v38 = vadd.f32 %v986_v28, %v966_v51  ;;  %v1054_v62 = vmul.f32 %v3536_v18, %v847_v16 }
 0x271   :  { %v2435_v21 = vmul.f32 -1.442695, %v4020_v24  ;;  %v951_v60 = vmul.f32 %v3534_v14, %v3926_v13  ;;  %v883_v49 = vadd.f32 %v867_v10, %v815_v29  ;;  %v1242_v61 = vmul.f32 %v3548_v42, %v847_v16 }
 0x272   :  { %v1193_v56 = vadd.f32 %v3835_v53, %v1157_v12  ;;  %v1190_v31 = vadd.f32 %v1174_v7, %v1154_v5  ;;  %v1139_v30 = vmul.f32 %v3538_v25, %v3926_v13  ;;  %v1070_v57 = vadd.f32 %v1054_v62, %v1002_v38 }
 0x273   :  { %3089 = vpow2.f32 %v2435_v21  ;;  %v1340_v8 = vadd.f32 1.0, %v3084_v35  ;;  %v987_v53 = vmul.f32 %v3523_v0, %v3902_v44  ;;  %v967_v52 = vadd.f32 %v951_v60, %v883_v49 }
 0x274   :  { %v1261_v4 = vadd.f32 %v3843_v48, %v1193_v56  ;;  %v1258_v1 = vadd.f32 %v1242_v61, %v1190_v31  ;;  %3091 = vrcp.f32 %v1336_v47  ;;  %v1175_v14 = vmul.f32 %v3525_v40, %v3902_v44  ;;  %v3086_v17 = vpop.eup %3085 }
 0x275   :  { %v1155_v41 = vadd.f32 %v1139_v30, %v1070_v57  ;;  %v1337_v6 = vadd.f32 1.0, %v3082_v37  ;;  %v1055_v13 = vmul.f32 %v3536_v18, %v3958_v2  ;;  %v1003_v48 = vadd.f32 %v987_v53, %v967_v52 }
 0x276   :  { %v4041_v9 = vadd.f32 %v3724_v34, %v1261_v4  ;;  %v4044_v32 = vadd.f32 %v3724_v34, %v1258_v1  ;;  %v1338_v0 = vadd.f32 1.0, %v3975_v19  ;;  %v1339_v16 = vadd.f32 1.0, %v3080_v55  ;;  %v3088_v43 = vpop.eup %3087 }
 0x277   :  { %v1243_v28 = vmul.f32 %v3548_v42, %v3958_v2  ;;  %v1191_v44 = vadd.f32 %v1175_v14, %v1155_v41  ;;  %3093 = vrcp.f32 %v1340_v8  ;;  %v1140_v37 = vmul.f32 %v3538_v25, %v3987_v11 }
 0x278   :  { %v1071_v18 = vadd.f32 %v1055_v13, %v1003_v48  ;;  %v2436_v35 = vmul.f32 -1.442695, %v4044_v32  ;;  %v1396_v12 = vadd.f32 %v3962_v54, %v3965_v3  ;;  %v1341_v29 = vadd.f32 1.0, %v3086_v17 }
 0x279   :  { %v1259_v51 = vadd.f32 %v1243_v28, %v1191_v44  ;;  %3095 = vrcp.f32 %v1337_v6  ;;  %v1176_v19 = vmul.f32 %v3525_v40, %v3973_v59  ;;  %v2439_v2 = vmul.f32 -1.442695, %v4041_v9 }
 0x27a   :  { %v1156_v55 = vadd.f32 %v1140_v37, %v1071_v18  ;;  %3097 = vpow2.f32 %v2436_v35  ;;  %v4060_v25 = vmul.f32 %v3990_v26, %v3832_v22  ;;  %v1244_v54 = vmul.f32 %v3548_v42, %v4003_v39 }
 0x27b   :  { %3099 = vrcp.f32 %v1339_v16  ;;  %v1280_v47 = vadd.f32 %v3724_v34, %v1259_v51  ;;  %v4066_v56 = vmul.f32 %v3088_v43, %v3879_v23 }
 0x27c   :  { %3101 = vrcp.f32 %v1338_v0  ;;  %v1192_v11 = vadd.f32 %v1176_v19, %v1156_v55  ;;  %v1397_v40 = vadd.f32 %v1396_v12, %v4060_v25 }
 0x27d   :  { %v3090_v10 = vpop.eup %3089  ;;  %3103 = vrcp.f32 %v1341_v29  ;;  %v2437_v5 = vmul.f32 -1.442695, %v1280_v47 }
 0x27e   :  { %3105 = vpow2.f32 %v2439_v2  ;;  %v1260_v59 = vadd.f32 %v1244_v54, %v1192_v11  ;;  %v3092_v7 = vpop.eup %3091  ;;  %v1342_v21 = vadd.f32 1.0, %v3090_v10  ;;  %v1398_v42 = vadd.f32 %v1397_v40, %v4066_v56 }
 0x27f   :  { %3107 = vpow2.f32 %v2437_v5  ;;  %v4070_v38 = vmul.f32 %v3092_v7, %v3917_v33 }
 0x280   :  { %v1281_v22 = vadd.f32 %v3724_v34, %v1260_v59  ;;  %3109 = vrcp.f32 %v1342_v21 }
 0x281   :  { %v3094_v26 = vpop.eup %3093  ;;  %v1399_v30 = vadd.f32 %v1398_v42, %v4070_v38 }
 0x282   :  { %v2438_v39 = vmul.f32 -1.442695, %v1281_v22  ;;  %v4075_v23 = vmul.f32 %v3094_v26, %v3947_v50 }
 0x283   :  { %v3096_v62 = vpop.eup %3095 }
 0x284   :  { %v3098_v60 = vpop.eup %3097  ;;  %3111 = vpow2.f32 %v2438_v39  ;;  %v4078_v34 = vmul.f32 %v3096_v62, %v3942_v46 }
 0x285   :  { %v3100_v49 = vpop.eup %3099  ;;  %v1343_v31 = vadd.f32 1.0, %v3098_v60  ;;  %v2897_v60 = vld [vmem:[%s4364_s3 + $0x80] sm:$0xff]  }
 0x286   :  { %v3102_v61 = vpop.eup %3101  ;;  %v4081_v57 = vmul.f32 %v3100_v49, %v3934_v58  ;;  %v1400_v50 = vadd.f32 %v1399_v30, %v4078_v34  ;;  %2759 = vmatpush3.bf16.msra.mxu1 %v2897_v60  ;;  %v2898_v49 = vld [vmem:[%s4364_s3 + $0x88] sm:$0xff]   ;;  %v2901_v30 = vld [vmem:[%s4364_s3 + $0xa0] sm:$0xff]  }
 0x287   :  { %v3104_v33 = vpop.eup %3103  ;;  %3113 = vrcp.f32 %v1343_v31  ;;  %v4090_v14 = vmul.f32 %v3102_v61, %v3885_v63  ;;  %2760 = vmatprep.subr.bf16.mxu1 %v4405_v27  ;;  %v2899_v31 = vld [vmem:[%s4364_s3 + $0x90] sm:$0xff]   ;;  %v2900_v61 = vld [vmem:[%s4364_s3 + $0x98] sm:$0xff]  }
 0x288   :  { %v3106_v4 = vpop.eup %3105  ;;  %v1408_v53 = vadd.f32 %v4075_v23, %v4081_v57  ;;  %v4086_v52 = vmul.f32 %v3104_v33, %v3978_v20  ;;  %v2902_v33 = vld [vmem:[%s4364_s3 + $0xa8] sm:$0xff]  }
 0x289   :  { %v3108_v8 = vpop.eup %3107  ;;  %v1346_v46 = vadd.f32 1.0, %v3106_v4  ;;  %v1401_v17 = vadd.f32 %v1400_v50, %v4090_v14  ;;  %v2903_v4 = vld [vmem:[%s4364_s3 + $0xb0] sm:$0xff]  }
 0x28a   :  { %v1344_v1 = vadd.f32 1.0, %v3108_v8  ;;  %v3110_v41 = vpop.eup %3109  ;;  %v1409_v58 = vadd.f32 %v1408_v53, %v4086_v52  ;;  %2761 = vmatpush3.bf16.msra.mxu1 %v2898_v49  ;;  %v2904_v8 = vld [vmem:[%s4364_s3 + $0xb8] sm:$0xff]   ;;  %v2456_v53 = vld [vmem:[%s4365_s4 + $0x2] ss:$0 sm:$0xff] }
 0x28b   :  { %v4095_v48 = vmul.f32 %v3110_v41, %v4020_v24  ;;  %v1402_v16 = vrot.slane %v1401_v17, 4  ;;  %2762 = vmatprep.subr.bf16.mxu1 %v4405_v27 }
 0x28c   :  { %3115 = vrcp.f32 %v1344_v1 }
 0x28d   :  { %3117 = vrcp.f32 %v1346_v46  ;;  %v1410_v0 = vadd.f32 %v1409_v58, %v4095_v48  ;;  %v1403_v43 = vadd.f32 %v1402_v16, %v1401_v17 }
 0x28e   :  { %v3112_v6 = vpop.eup %3111  ;;  %2763 = vmatpush3.bf16.msra.mxu1 %v2899_v31 }
 0x28f   :  { %v1345_v13 = vadd.f32 1.0, %v3112_v6  ;;  %v1404_v24 = vrot.slane %v1403_v43, 2  ;;  %2764 = vmatprep.subr.bf16.mxu1 %v4405_v27 }
 0x291   :  { %v3114_v20 = vpop.eup %3113  ;;  %3119 = vrcp.f32 %v1345_v13  ;;  %v1405_v19 = vadd.f32 %v1404_v24, %v1403_v43  ;;  %v2907_v43 = vld [vmem:[%s4364_s3 + $0xd0] sm:$0xff]   ;;  %v2910_v24 = vld [vmem:[%s4364_s3 + $0xe8] sm:$0xff]  }
 0x292   :  { %v4099_v63 = vmul.f32 %v3114_v20, %v4044_v32  ;;  %2765 = vmatpush3.bf16.msra.mxu1 %v2900_v61 }
 0x293   :  { %v1406_v55 = vrot.slane %v1405_v19, 1  ;;  %2766 = vmatprep.subr.bf16.mxu1 %v4405_v27 }
 0x294   :  { %v1411_v44 = vadd.f32 %v1410_v0, %v4099_v63 }
 0x296   :  { %v3116_v28 = vpop.eup %3115  ;;  %2767 = vmatpush3.bf16.msra.mxu1 %v2901_v30 }
 0x297   :  { %v4102_v37 = vmul.f32 %v3116_v28, %v1280_v47  ;;  %v3118_v18 = vpop.eup %3117  ;;  %v1407_v47 = vadd.f32 %v1406_v55, %v1405_v19  ;;  %2768 = vmatprep.subr.bf16.mxu1 %v4405_v27  ;;  %v2905_v28 = vld [vmem:[%s4364_s3 + $0xc0] sm:$0xff]   ;;  %v2912_v19 = vld [vmem:[%s4364_s3 + $0xf8] sm:$0xff]   ;;  %v2915_v55 = vld [vmem:[%s4364_s3 + $0x110] sm:$0xff]  }
 0x298   :  { %v4108_v51 = vmul.f32 %v3118_v18, %v4041_v9  ;;  %2778 = vmatprep.subr.bf16.mxu0 %v2905_v28  ;;  %v2908_v18 = vld [vmem:[%s4364_s3 + $0xd8] sm:$0xff]  }
 0x299   :  { %v1412_v35 = vadd.f32 %v1411_v44, %v4102_v37  ;;  %v1422_v59 = vmul.f32 0.015625, %v1407_v47  ;;  %v2906_v44 = vld [vmem:[%s4364_s3 + $0xc8] sm:$0xff]  }
 0x29a   :  { %2769 = vmatpush3.bf16.msra.mxu1 %v2902_v33  ;;  %v2918_v47 = vld [vmem:[%s4364_s3 + $0x128] sm:$0xff]   ;;  %v4406_v33 = vld [vmem:[#allocation20_spill] sm:$0xff] }
 0x29b   :  { %v3120_v12 = vpop.eup %3119  ;;  %2770 = vmatprep.subr.bf16.mxu1 %v4405_v27 }
 0x29c   :  { %v4105_v29 = vmul.f32 %v3120_v12, %v1281_v22  ;;  %v1424_v22 = vpack.c.bf16 %v1422_v59, %v1422_v59  ;;  %v2911_v12 = vld [vmem:[%s4364_s3 + $0xf0] sm:$0xff]  }
 0x29e   :  { %v1413_v32 = vadd.f32 %v1412_v35, %v4105_v29  ;;  %v1450_v9 = vunpack.c.l.b16 %v1424_v22  ;;  %2771 = vmatpush3.bf16.msra.mxu1 %v2903_v4  ;;  %v2909_v35 = vld [vmem:[%s4364_s3 + $0xe0] sm:$0xff]  }
 0x29f   :  { %2772 = vmatprep.subr.bf16.mxu1 %v4405_v27 }
 0x2a0   :  { %v1414_v2 = vadd.f32 %v1413_v32, %v4108_v51  ;;  %v2913_v32 = vld [vmem:[%s4364_s3 + $0x100] sm:$0xff]  }
 0x2a2   :  { %v1415_v54 = vrot.slane %v1414_v2, 4  ;;  %2773 = vmatpush3.bf16.msra.mxu1 %v2904_v8 }
 0x2a3   :  { %2810 = vmatprep.subr.bf16.mxu1 %v2913_v32 }
 0x2a4   :  { %v1416_v11 = vadd.f32 %v1415_v54, %v1414_v2  ;;  %v2914_v2 = vld [vmem:[%s4364_s3 + $0x108] sm:$0xff]   ;;  %v2916_v54 = vld [vmem:[%s4364_s3 + $0x118] sm:$0xff]  }
 0x2a6   :  { %v1417_v10 = vrot.slane %v1416_v11, 2 }
 0x2a8   :  { %v1418_v5 = vadd.f32 %v1417_v10, %v1416_v11  ;;  %v2917_v11 = vld [vmem:[%s4364_s3 + $0x120] sm:$0xff]  }
 0x2a9   :  { %v2482_v10 = vld [vmem:[%s4365_s4 + $0x3] ss:$0 sm:$0xff] }
 0x2aa   :  { %v1419_v40 = vrot.slane %v1418_v5, 1 }
 0x2ac   :  { %v1420_v7 = vadd.f32 %v1419_v40, %v1418_v5 }
 0x2ae   :  { %v1423_v21 = vmul.f32 0.015625, %v1420_v7 }
 0x2b0   :  { %v1425_v26 = vpack.c.bf16 %v1423_v21, %v1423_v21 }
 0x2b2   :  { %v1451_v42 = vunpack.c.l.b16 %v1425_v26 }
 0x2b4   :  { %v1453_v39 = vsel %vm1452_vm3, %v1451_v42, %v1450_v9  ;;  %v3195_v42 = vmov 1966171168  }
 0x2b5   :  { %v1454_v62 = vpack.c.b16 %v1453_v39, %v1453_v39  ;;  %v1670_v39 = vunpack.c.l.s4 %v3195_v42 }
 0x2b7   :  { %2755 = vmatmul.mubr.bf16.vlgmr.msra.gmra.mrb[16].mxu0 %v1454_v62  ;;  %v1671_v62 = vunpack.c.0.s8 %v1670_v39 }
 0x2b8   :  { %2779 = vmatpush3.bf16.msra.mxu0 %v2905_v28 }
 0x2b9   :  { %2780 = vmatprep.subr.bf16.mxu0 %v2906_v44  ;;  %v1674_v60 = vsub.s32 %v1671_v62, %v3457_v45  ;;  %v4411_v62 = vld [vmem:[#allocation11_spill] sm:$0xff] }
 0x2bc   :  { %2781 = vmatpush3.bf16.msra.mxu0 %v2906_v44 }
 0x2bd   :  { %2782 = vmatprep.subr.bf16.mxu0 %v2907_v43 }
 0x2c0   :  { %2783 = vmatpush3.bf16.msra.mxu0 %v2907_v43 }
 0x2c1   :  { %2784 = vmatprep.subr.bf16.mxu0 %v2908_v18 }
 0x2c4   :  { %2785 = vmatpush3.bf16.msra.mxu0 %v2908_v18 }
 0x2c5   :  { %2786 = vmatprep.subr.bf16.mxu0 %v2909_v35 }
 0x2c8   :  { %2787 = vmatpush3.bf16.msra.mxu0 %v2909_v35 }
 0x2c9   :  { %2788 = vmatprep.subr.bf16.mxu0 %v2910_v24 }
 0x2cc   :  { %2789 = vmatpush3.bf16.msra.mxu0 %v2910_v24 }
 0x2cd   :  { %2790 = vmatprep.subr.bf16.mxu0 %v2911_v12 }
 0x2d0   :  { %2791 = vmatpush3.bf16.msra.mxu0 %v2911_v12 }
 0x2d1   :  { %2792 = vmatprep.subr.bf16.mxu0 %v2912_v19 }
 0x2d4   :  { %2793 = vmatpush3.bf16.msra.mxu0 %v2912_v19  ;;  %v4407_v19 = vld [vmem:[#allocation7_spill] sm:$0xff] }
 0x2d5   :  { %2842 = vmatprep.subr.bf16.mxu0 %v4405_v27 }
 0x38a   :  { %v1538_v1 = vpop.f32.mrb[16].mxu0 }
 0x38b   :  { %v1539_v50 = vadd.f32 %v2456_v53, %v1538_v1  ;;  %v2756_v46 = vpop.f32.mrb[17].mxu0 }
 0x38c   :  { %v1541_v41 = vpop.f32.mrb[18].mxu0 }
 0x38d   :  { %v2465_v6 = vmul.f32 -1.442695, %v1539_v50  ;;  %v2757_v58 = vpop.f32.mrb[19].mxu0 }
 0x38f   :  { %3121 = vpow2.f32 %v2465_v6 }
 0x399   :  { %v3122_v17 = vpop.eup %3121 }
 0x39a   :  { %v1547_v13 = vadd.f32 1.0, %v3122_v17 }
 0x39c   :  { %3123 = vrcp.f32 %v1547_v13 }
 0x3a6   :  { %v3124_v20 = vpop.eup %3123 }
 0x3a7   :  { %v1550_v0 = vmul.f32 %v3124_v20, %v1539_v50 }
 0x3a9   :  { %v1551_v16 = vpack.c.bf16 %v1550_v0, %v1550_v0 }
 0x3ab   :  { %2775 = vmatmul.mubr.bf16.vlgmr.msra.gmra.mrb[16].mxu1 %v1551_v16 }
 0x3ac   :  { %2811 = vmatpush3.bf16.msra.mxu1 %v2913_v32 }
 0x3ad   :  { %2812 = vmatprep.subr.bf16.mxu1 %v2914_v2 }
 0x3b0   :  { %2813 = vmatpush3.bf16.msra.mxu1 %v2914_v2  ;;  %v4408_v2 = vld [vmem:[#allocation4_spill] sm:$0xff] }
 0x3b1   :  { %2814 = vmatprep.subr.bf16.mxu1 %v2915_v55 }
 0x3b4   :  { %2815 = vmatpush3.bf16.msra.mxu1 %v2915_v55 }
 0x3b5   :  { %2816 = vmatprep.subr.bf16.mxu1 %v2916_v54 }
 0x3b8   :  { %2817 = vmatpush3.bf16.msra.mxu1 %v2916_v54  ;;  %v4409_v54 = vld [vmem:[#allocation5_spill] sm:$0xff] }
 0x3b9   :  { %2818 = vmatprep.subr.bf16.mxu1 %v2917_v11 }
 0x3bc   :  { %2819 = vmatpush3.bf16.msra.mxu1 %v2917_v11 }
 0x3bd   :  { %2820 = vmatprep.subr.bf16.mxu1 %v2918_v47 }
 0x3c0   :  { %2821 = vmatpush3.bf16.msra.mxu1 %v2918_v47  ;;  %v4410_v47 = vld [vmem:[#allocation6_spill] sm:$0xff] }
 0x47e   :  { %v1656_v5 = vpop.f32.mrb[16].mxu1 }
 0x47f   :  { %v1657_v40 = vadd.f32 %v2482_v10, %v1656_v5  ;;  %v2776_v59 = vpop.f32.mrb[17].mxu1 }
 0x480   :  { %v1659_v7 = vpop.f32.mrb[18].mxu1 }
 0x481   :  { %v2491_v21 = vmul.f32 -1.442695, %v1657_v40  ;;  %v2777_v22 = vpop.f32.mrb[19].mxu1 }
 0x483   :  { %3125 = vpow2.f32 %v2491_v21 }
 0x48d   :  { %v3126_v26 = vpop.eup %3125 }
 0x48e   :  { %v1665_v9 = vadd.f32 1.0, %v3126_v26 }
 0x490   :  { %3127 = vrcp.f32 %v1665_v9 }
 0x49a   :  { %v3128_v49 = vpop.eup %3127 }
 0x49b   :  { %v1675_v31 = vrot.slane %v3128_v49, %v1674_v60  ;;  %v4412_v49 = vld [vmem:[#allocation8_spill] sm:$0xff] }
 0x49d   :  { %v1676_v61 = vcombine.high %v1675_v31, %v1675_v31  ;;  %v1683_v30 = vrot.slane %v1675_v31, %v1674_v60 }
 0x49f   :  { %v1694_v4 = vrot.slane %v1683_v30, %v4406_v33  ;;  %v1690_v8 = vrot.slane %v1676_v61, %v1674_v60  ;;  %v4413_v61 = vld [vmem:[#allocation9_spill] sm:$0xff] }
 0x4a1   :  { %v1701_v53 = vmul.f32 %v1694_v4, %v3952_v36  ;;  %v1702_v1 = vmul.f32 %v1694_v4, %v3938_v15  ;;  %v1703_v50 = vmul.f32 %v1694_v4, %v3965_v3  ;;  %v1704_v46 = vmul.f32 %v1694_v4, %v4060_v25 }
 0x4a2   :  { %v1705_v41 = vmul.f32 %v1694_v4, %v4066_v56  ;;  %v1706_v6 = vmul.f32 %v1694_v4, %v4070_v38  ;;  %v1698_v17 = vrot.slane %v1690_v8, %v4406_v33  ;;  %v1707_v36 = vmul.f32 %v1694_v4, %v4078_v34  ;;  %v4414_v33 = vld [vmem:[#allocation10_spill] sm:$0xff] }
 0x4a3   :  { %v1717_v45 = vpack.c.bf16 %v1702_v1, %v1701_v53  ;;  %v1718_v58 = vpack.c.bf16 %v1704_v46, %v1703_v50  ;;  %v1708_v15 = vmul.f32 %v1694_v4, %v4090_v14 }
 0x4a4   :  { %v1719_v13 = vpack.c.bf16 %v1706_v6, %v1705_v41  ;;  %v1709_v3 = vmul.f32 %v1698_v17, %v4081_v57  ;;  %v1710_v25 = vmul.f32 %v1698_v17, %v4075_v23  ;;  %v1711_v38 = vmul.f32 %v1698_v17, %v4086_v52  ;;  %v2919_v52 = vld [vmem:[%s4364_s3 + $0x130] sm:$0xff]  }
 0x4a5   :  { %2794 = vmatprep.mubr.bf16.mxu0 %v1717_v45  ;;  %v1720_v20 = vpack.c.bf16 %v1708_v15, %v1707_v36  ;;  %v1712_v0 = vmul.f32 %v1698_v17, %v4095_v48  ;;  %v1713_v16 = vmul.f32 %v1698_v17, %v4099_v63  ;;  %v1714_v28 = vmul.f32 %v1698_v17, %v4102_v37  ;;  %v2920_v48 = vld [vmem:[%s4364_s3 + $0x138] sm:$0xff]   ;;  %v2508_v63 = vld [vmem:[%s4365_s4 + $0x4] ss:$0 sm:$0xff] }
 0x4a6   :  { %2795 = vmatmul.mubr.bf16.vlgmr.msra.gmra.mrb[20].mxu0 %v1718_v58  ;;  %v1721_v56 = vpack.c.bf16 %v1710_v25, %v1709_v3  ;;  %v1715_v57 = vmul.f32 %v1698_v17, %v4105_v29  ;;  %v1716_v23 = vmul.f32 %v1698_v17, %v4108_v51  ;;  %2822 = vmatprep.subr.bf16.mxu1 %v2919_v52  ;;  %v4416_v15 = vld [vmem:[#allocation12_spill] sm:$0xff]  ;;  %v4417_v25 = vld [vmem:[#allocation13_spill] sm:$0xff] }
 0x4a7   :  { %2798 = vmatprep.mubr.bf16.mxu0 %v1719_v13  ;;  %v1722_v44 = vpack.c.bf16 %v1712_v0, %v1711_v38  ;;  %v1723_v34 = vpack.c.bf16 %v1714_v28, %v1713_v16  ;;  %2823 = vmatpush3.bf16.msra.mxu1 %v2919_v52  ;;  %v4415_v13 = vld [vmem:[#allocation15_spill] sm:$0xff] }
 0x4a8   :  { %v1724_v14 = vpack.c.bf16 %v1716_v23, %v1715_v57  ;;  %2824 = vmatprep.subr.bf16.mxu1 %v2920_v48 }
 0x4ab   :  { %2825 = vmatpush3.bf16.msra.mxu1 %v2920_v48 }
 0x4ae   :  { %2799 = vmatmul.mubr.bf16.gmra.mrb[24].mxu0 %v1720_v20 }
 0x4af   :  { %2802 = vmatprep.mubr.bf16.mxu0 %v1721_v56  ;;  %v4418_v56 = vld [vmem:[#allocation14_spill] sm:$0xff] }
 0x4b6   :  { %2803 = vmatmul.mubr.bf16.gmra.mrb[28].mxu0 %v1722_v44 }
 0x4b7   :  { %2806 = vmatprep.mubr.bf16.mxu0 %v1723_v34 }
 0x4be   :  { %2807 = vmatmul.mubr.bf16.gmra.mrb[32].mxu0 %v1724_v14 }
 0x4bf   :  { %2858 = vmatprep.mubr.msk.bf16.mxu0 %vm3194_vm2, %v4405_v27 }
 0x579   :  { %v2796_v37 = vpop.f32.mrb[20].mxu0 }
 0x57a   :  { %v1838_v29 = vadd.f32 %v2796_v37, %v2508_v63  ;;  %v1829_v51 = vpop.f32.mrb[21].mxu0  ;;  %v4419_v37 = vld [vmem:[#allocation19_spill] sm:$0xff] }
 0x57b   :  { %v1830_v43 = vadd.f32 %v2508_v63, %v1829_v51  ;;  %v2797_v18 = vpop.f32.mrb[22].mxu0  ;;  %v4420_v51 = vld [vmem:[#allocation16_spill] sm:$0xff] }
 0x57c   :  { %v1841_v35 = vadd.f32 %v2797_v18, %v2508_v63  ;;  %v1832_v24 = vpop.f32.mrb[23].mxu0  ;;  %v1910_v32 = vadd.f32 %v1838_v29, %v4407_v19  ;;  %v4421_v18 = vld [vmem:[#allocation17_spill] sm:$0xff] }
 0x57d   :  { %v1833_v12 = vadd.f32 %v2508_v63, %v1832_v24  ;;  %v1908_v11 = vadd.f32 %v1830_v43, %v4409_v54  ;;  %v4422_v24 = vld [vmem:[#allocation18_spill] sm:$0xff]  ;;  %v2924_v54 = vld [vmem:[%s4364_s3 + $0x158] sm:$0xff]  }
 0x57e   :  { %v1911_v55 = vadd.f32 %v1841_v35, %v4408_v2  ;;  %v2921_v2 = vld [vmem:[%s4364_s3 + $0x140] sm:$0xff]  }
 0x57f   :  { %v1909_v10 = vadd.f32 %v1833_v12, %v4410_v47  ;;  %2843 = vmatpush3.bf16.msra.mxu0 %v2921_v2  ;;  %v2926_v47 = vld [vmem:[%s4364_s3 + $0x168] sm:$0xff]  }
 0x580   :  { %v1925_v5 = vpack.c.bf16 %v1911_v55, %v1910_v32  ;;  %2844 = vmatprep.subr.bf16.mxu0 %v4405_v27  ;;  %v2923_v55 = vld [vmem:[%s4364_s3 + $0x150] sm:$0xff]  }
 0x581   :  { %v2800_v40 = vpop.f32.mrb[24].mxu0  ;;  %v1924_v59 = vpack.c.bf16 %v1909_v10, %v1908_v11  ;;  %v2925_v11 = vld [vmem:[%s4364_s3 + $0x160] sm:$0xff]   ;;  %v2927_v10 = vld [vmem:[%s4364_s3 + $0x170] sm:$0xff]  }
 0x582   :  { %v1854_v7 = vadd.f32 %v2800_v40, %v2508_v63  ;;  %v1845_v21 = vpop.f32.mrb[25].mxu0  ;;  %v4273_v40 = vld [vmem:[%s4365_s4 + $0x5] ss:$0 sm:$0xff] }
 0x583   :  { %v1846_v22 = vadd.f32 %v2508_v63, %v1845_v21  ;;  %v2801_v26 = vpop.f32.mrb[26].mxu0  ;;  %2826 = vmatprep.mubr.bf16.mxu1 %v1924_v59 }
 0x584   :  { %v1857_v9 = vadd.f32 %v2801_v26, %v2508_v63  ;;  %v1848_v42 = vpop.f32.mrb[27].mxu0  ;;  %2827 = vmatmul.mubr.bf16.vlgmr.msra.gmra.mrb[20].mxu1 %v1925_v5  ;;  %v1914_v60 = vadd.f32 %v1854_v7, %v4411_v62  ;;  %v2928_v5 = vld [vmem:[%s4364_s3 + $0x178] sm:$0xff]  }
 0x585   :  { %v1849_v39 = vadd.f32 %v2508_v63, %v1848_v42  ;;  %v1912_v30 = vadd.f32 %v1846_v22, %v4413_v61 }
 0x586   :  { %v1915_v31 = vadd.f32 %v1857_v9, %v4412_v49 }
 0x587   :  { %v1913_v4 = vadd.f32 %v1849_v39, %v4414_v33 }
 0x588   :  { %v1927_v8 = vpack.c.bf16 %v1915_v31, %v1914_v60 }
 0x589   :  { %v2804_v53 = vpop.f32.mrb[28].mxu0  ;;  %v1926_v1 = vpack.c.bf16 %v1913_v4, %v1912_v30 }
 0x58a   :  { %v1870_v50 = vadd.f32 %v2804_v53, %v2508_v63  ;;  %v1861_v46 = vpop.f32.mrb[29].mxu0 }
 0x58b   :  { %v1862_v41 = vadd.f32 %v2508_v63, %v1861_v46  ;;  %v2805_v6 = vpop.f32.mrb[30].mxu0  ;;  %2830 = vmatprep.mubr.bf16.mxu1 %v1926_v1 }
 0x58c   :  { %v1873_v45 = vadd.f32 %v2805_v6, %v2508_v63  ;;  %v1864_v58 = vpop.f32.mrb[31].mxu0  ;;  %2831 = vmatmul.mubr.bf16.gmra.mrb[24].mxu1 %v1927_v8  ;;  %v1918_v36 = vadd.f32 %v1870_v50, %v4415_v13 }
 0x58d   :  { %v1865_v17 = vadd.f32 %v2508_v63, %v1864_v58  ;;  %v1916_v20 = vadd.f32 %v1862_v41, %v4417_v25 }
 0x58e   :  { %v1919_v3 = vadd.f32 %v1873_v45, %v4416_v15 }
 0x58f   :  { %v1917_v38 = vadd.f32 %v1865_v17, %v4418_v56 }
 0x590   :  { %v1929_v0 = vpack.c.bf16 %v1919_v3, %v1918_v36 }
 0x591   :  { %v2808_v16 = vpop.f32.mrb[32].mxu0  ;;  %v1928_v28 = vpack.c.bf16 %v1917_v38, %v1916_v20 }
 0x592   :  { %v1886_v44 = vadd.f32 %v2808_v16, %v2508_v63  ;;  %v1877_v34 = vpop.f32.mrb[33].mxu0 }
 0x593   :  { %v1878_v57 = vadd.f32 %v2508_v63, %v1877_v34  ;;  %v2809_v23 = vpop.f32.mrb[34].mxu0  ;;  %2834 = vmatprep.mubr.bf16.mxu1 %v1928_v28 }
 0x594   :  { %v1889_v14 = vadd.f32 %v2809_v23, %v2508_v63  ;;  %v1880_v52 = vpop.f32.mrb[35].mxu0  ;;  %2835 = vmatmul.mubr.bf16.gmra.mrb[28].mxu1 %v1929_v0  ;;  %v1922_v29 = vadd.f32 %v1886_v44, %v4419_v37 }
 0x595   :  { %v1881_v48 = vadd.f32 %v2508_v63, %v1880_v52  ;;  %v1920_v35 = vadd.f32 %v1878_v57, %v4421_v18  ;;  %v2922_v63 = vld [vmem:[%s4364_s3 + $0x148] sm:$0xff]  }
 0x596   :  { %v1923_v43 = vadd.f32 %v1889_v14, %v4420_v51  ;;  %2845 = vmatpush3.bf16.msra.mxu0 %v2922_v63 }
 0x597   :  { %v1921_v12 = vadd.f32 %v1881_v48, %v4422_v24  ;;  %2846 = vmatprep.subr.bf16.mxu0 %v4405_v27 }
 0x598   :  { %v1931_v19 = vpack.c.bf16 %v1923_v43, %v1922_v29 }
 0x599   :  { %v1930_v32 = vpack.c.bf16 %v1921_v12, %v1920_v35 }
 0x59a   :  { %2847 = vmatpush3.bf16.msra.mxu0 %v2923_v55 }
 0x59b   :  { %2838 = vmatprep.mubr.bf16.mxu1 %v1930_v32  ;;  %2848 = vmatprep.subr.bf16.mxu0 %v4405_v27 }
 0x59c   :  { %2839 = vmatmul.mubr.bf16.gmra.mrb[32].mxu1 %v1931_v19 }
 0x59e   :  { %2849 = vmatpush3.bf16.msra.mxu0 %v2924_v54 }
 0x59f   :  { %2850 = vmatprep.subr.bf16.mxu0 %v4405_v27 }
 0x5a2   :  { %2851 = vmatpush3.bf16.msra.mxu0 %v2925_v11 }
 0x5a3   :  { %2852 = vmatprep.subr.bf16.mxu0 %v4405_v27 }
 0x5a6   :  { %2853 = vmatpush3.bf16.msra.mxu0 %v2926_v47 }
 0x5a7   :  { %2854 = vmatprep.subr.bf16.mxu0 %v4405_v27 }
 0x5aa   :  { %2855 = vmatpush3.bf16.msra.mxu0 %v2927_v10 }
 0x5ab   :  { %2856 = vmatprep.subr.bf16.mxu0 %v4405_v27 }
 0x5ae   :  { %2857 = vmatpush3.bf16.msra.mxu0 %v2928_v5 }
 0x657   :  { %v2828_v59 = vpop.f32.mrb[20].mxu1 }
 0x658   :  { %v4276_v7 = vadd.f32 %v2828_v59, %v4273_v40  ;;  %v2036_v21 = vpop.f32.mrb[21].mxu1 }
 0x659   :  { %v4279_v22 = vadd.f32 %v4273_v40, %v2036_v21  ;;  %v2829_v26 = vpop.f32.mrb[22].mxu1 }
 0x65a   :  { %v2544_v9 = vmul.f32 -1.442695, %v4276_v7  ;;  %v4283_v42 = vadd.f32 %v2829_v26, %v4273_v40  ;;  %v2039_v27 = vpop.f32.mrb[23].mxu1 }
 0x65b   :  { %v2542_v39 = vmul.f32 -1.442695, %v4279_v22  ;;  %v4287_v62 = vadd.f32 %v4273_v40, %v2039_v27 }
 0x65c   :  { %3129 = vpow2.f32 %v2544_v9  ;;  %v2545_v60 = vmul.f32 -1.442695, %v4283_v42 }
 0x65d   :  { %3131 = vpow2.f32 %v2542_v39  ;;  %v2543_v49 = vmul.f32 -1.442695, %v4287_v62 }
 0x65e   :  { %3133 = vpow2.f32 %v2545_v60 }
 0x65f   :  { %3135 = vpow2.f32 %v2543_v49  ;;  %v2832_v31 = vpop.f32.mrb[24].mxu1 }
 0x660   :  { %v4292_v61 = vadd.f32 %v2832_v31, %v4273_v40  ;;  %v2052_v30 = vpop.f32.mrb[25].mxu1 }
 0x661   :  { %v4295_v33 = vadd.f32 %v4273_v40, %v2052_v30  ;;  %v2833_v4 = vpop.f32.mrb[26].mxu1 }
 0x662   :  { %v2548_v8 = vmul.f32 -1.442695, %v4292_v61  ;;  %v4299_v53 = vadd.f32 %v2833_v4, %v4273_v40  ;;  %v2055_v1 = vpop.f32.mrb[27].mxu1 }
 0x663   :  { %v2546_v50 = vmul.f32 -1.442695, %v4295_v33  ;;  %v4303_v46 = vadd.f32 %v4273_v40, %v2055_v1 }
 0x664   :  { %3137 = vpow2.f32 %v2548_v8  ;;  %v2549_v41 = vmul.f32 -1.442695, %v4299_v53 }
 0x665   :  { %3139 = vpow2.f32 %v2546_v50  ;;  %v2547_v6 = vmul.f32 -1.442695, %v4303_v46 }
 0x666   :  { %v3130_v45 = vpop.eup %3129  ;;  %3141 = vpow2.f32 %v2549_v41 }
 0x667   :  { %v3132_v58 = vpop.eup %3131  ;;  %v2149_v17 = vadd.f32 1.0, %v3130_v45  ;;  %3143 = vpow2.f32 %v2547_v6  ;;  %v2836_v13 = vpop.f32.mrb[28].mxu1 }
 0x668   :  { %v3134_v36 = vpop.eup %3133  ;;  %v2147_v15 = vadd.f32 1.0, %v3132_v58  ;;  %v4308_v3 = vadd.f32 %v2836_v13, %v4273_v40  ;;  %v2068_v25 = vpop.f32.mrb[29].mxu1 }
 0x669   :  { %v3136_v20 = vpop.eup %3135  ;;  %3145 = vrcp.f32 %v2149_v17  ;;  %v2150_v56 = vadd.f32 1.0, %v3134_v36  ;;  %v4311_v38 = vadd.f32 %v4273_v40, %v2068_v25  ;;  %v2837_v0 = vpop.f32.mrb[30].mxu1 }
 0x66a   :  { %3147 = vrcp.f32 %v2147_v15  ;;  %v2148_v16 = vadd.f32 1.0, %v3136_v20  ;;  %v2552_v28 = vmul.f32 -1.442695, %v4308_v3  ;;  %v4315_v44 = vadd.f32 %v2837_v0, %v4273_v40  ;;  %v2071_v34 = vpop.f32.mrb[31].mxu1 }
 0x66b   :  { %3149 = vrcp.f32 %v2150_v56  ;;  %v2550_v57 = vmul.f32 -1.442695, %v4311_v38  ;;  %v4319_v23 = vadd.f32 %v4273_v40, %v2071_v34 }
 0x66c   :  { %3151 = vrcp.f32 %v2148_v16  ;;  %v2553_v14 = vmul.f32 -1.442695, %v4315_v44 }
 0x66d   :  { %3153 = vpow2.f32 %v2552_v28  ;;  %v2551_v52 = vmul.f32 -1.442695, %v4319_v23 }
 0x66e   :  { %v3138_v48 = vpop.eup %3137  ;;  %3155 = vpow2.f32 %v2550_v57 }
 0x66f   :  { %v3140_v37 = vpop.eup %3139  ;;  %v2153_v29 = vadd.f32 1.0, %v3138_v48  ;;  %3157 = vpow2.f32 %v2553_v14  ;;  %v2840_v51 = vpop.f32.mrb[32].mxu1 }
 0x670   :  { %v3142_v43 = vpop.eup %3141  ;;  %v2151_v18 = vadd.f32 1.0, %v3140_v37  ;;  %3159 = vpow2.f32 %v2551_v52  ;;  %v4324_v35 = vadd.f32 %v2840_v51, %v4273_v40  ;;  %v2084_v24 = vpop.f32.mrb[33].mxu1 }
 0x671   :  { %v3144_v12 = vpop.eup %3143  ;;  %3161 = vrcp.f32 %v2153_v29  ;;  %v2154_v19 = vadd.f32 1.0, %v3142_v43  ;;  %v4327_v32 = vadd.f32 %v4273_v40, %v2084_v24  ;;  %v2841_v2 = vpop.f32.mrb[34].mxu1 }
 0x672   :  { %3163 = vrcp.f32 %v2151_v18  ;;  %v2152_v63 = vadd.f32 1.0, %v3144_v12  ;;  %v2556_v55 = vmul.f32 -1.442695, %v4324_v35  ;;  %v4331_v54 = vadd.f32 %v2841_v2, %v4273_v40  ;;  %v2087_v11 = vpop.f32.mrb[35].mxu1 }
 0x673   :  { %v3146_v47 = vpop.eup %3145  ;;  %3165 = vrcp.f32 %v2154_v19  ;;  %v2554_v10 = vmul.f32 -1.442695, %v4327_v32  ;;  %v4335_v5 = vadd.f32 %v4273_v40, %v2087_v11 }
 0x674   :  { %v3148_v59 = vpop.eup %3147  ;;  %3167 = vrcp.f32 %v2152_v63  ;;  %v2557_v21 = vmul.f32 -1.442695, %v4331_v54  ;;  %v2197_v4 = vmul.f32 %v3146_v47, %v4276_v7 }
 0x675   :  { %v3150_v26 = vpop.eup %3149  ;;  %3169 = vpow2.f32 %v2556_v55  ;;  %v2555_v9 = vmul.f32 -1.442695, %v4335_v5  ;;  %v2195_v60 = vmul.f32 %v3148_v59, %v4279_v22 }
 0x676   :  { %v3152_v27 = vpop.eup %3151  ;;  %3171 = vpow2.f32 %v2554_v10  ;;  %v2198_v41 = vmul.f32 %v3150_v26, %v4283_v42 }
 0x677   :  { %v3154_v39 = vpop.eup %3153  ;;  %v2196_v49 = vmul.f32 %v3152_v27, %v4287_v62  ;;  %3173 = vpow2.f32 %v2557_v21 }
 0x678   :  { %v3156_v31 = vpop.eup %3155  ;;  %v2157_v30 = vadd.f32 1.0, %v3154_v39  ;;  %3175 = vpow2.f32 %v2555_v9 }
 0x679   :  { %v3158_v40 = vpop.eup %3157  ;;  %v2211_v8 = vadd.f32 %v2196_v49, %v2195_v60  ;;  %v2155_v1 = vadd.f32 1.0, %v3156_v31 }
 0x67a   :  { %v3160_v50 = vpop.eup %3159  ;;  %v2158_v58 = vadd.f32 1.0, %v3158_v40 }
 0x67b   :  { %v3162_v6 = vpop.eup %3161  ;;  %v2212_v45 = vadd.f32 %v2211_v8, %v2197_v4  ;;  %3177 = vrcp.f32 %v2155_v1  ;;  %v2156_v17 = vadd.f32 1.0, %v3160_v50 }
 0x67c   :  { %v3164_v22 = vpop.eup %3163  ;;  %3179 = vrcp.f32 %v2157_v30  ;;  %v2201_v16 = vmul.f32 %v3162_v6, %v4292_v61 }
 0x67d   :  { %v3166_v62 = vpop.eup %3165  ;;  %v2199_v13 = vmul.f32 %v3164_v22, %v4295_v33  ;;  %v2213_v36 = vadd.f32 %v2212_v45, %v2198_v41  ;;  %3181 = vrcp.f32 %v2156_v17 }
 0x67e   :  { %v3168_v15 = vpop.eup %3167  ;;  %3183 = vrcp.f32 %v2158_v58  ;;  %v2202_v14 = vmul.f32 %v3166_v62, %v4299_v53 }
 0x67f   :  { %v3170_v25 = vpop.eup %3169  ;;  %v2214_v7 = vadd.f32 %v2213_v36, %v2199_v13  ;;  %v2200_v20 = vmul.f32 %v3168_v15, %v4303_v46 }
 0x680   :  { %v3172_v56 = vpop.eup %3171  ;;  %v2161_v42 = vadd.f32 1.0, %v3170_v25 }
 0x681   :  { %v3174_v0 = vpop.eup %3173  ;;  %v2215_v28 = vadd.f32 %v2214_v7, %v2200_v20  ;;  %v2159_v34 = vadd.f32 1.0, %v3172_v56 }
 0x682   :  { %v3176_v57 = vpop.eup %3175  ;;  %v2162_v33 = vadd.f32 1.0, %v3174_v0 }
 0x683   :  { %v2216_v52 = vadd.f32 %v2215_v28, %v2201_v16  ;;  %3185 = vrcp.f32 %v2159_v34  ;;  %v2160_v48 = vadd.f32 1.0, %v3176_v57 }
 0x684   :  { %3187 = vrcp.f32 %v2161_v42 }
 0x685   :  { %v3178_v37 = vpop.eup %3177  ;;  %v2217_v29 = vadd.f32 %v2216_v52, %v2202_v14  ;;  %3189 = vrcp.f32 %v2160_v48 }
 0x686   :  { %v3180_v46 = vpop.eup %3179  ;;  %3191 = vrcp.f32 %v2162_v33  ;;  %v2203_v18 = vmul.f32 %v3178_v37, %v4311_v38 }
 0x687   :  { %v3182_v51 = vpop.eup %3181  ;;  %v2218_v43 = vrot.slane %v2217_v29, 4  ;;  %v2205_v12 = vmul.f32 %v3180_v46, %v4308_v3 }
 0x688   :  { %v2204_v61 = vmul.f32 %v3182_v51, %v4319_v23  ;;  %v3184_v24 = vpop.eup %3183 }
 0x689   :  { %v2219_v19 = vadd.f32 %v2218_v43, %v2217_v29  ;;  %v2206_v2 = vmul.f32 %v3184_v24, %v4315_v44 }
 0x68a   :  { %v2224_v53 = vadd.f32 %v2204_v61, %v2203_v18 }
 0x68b   :  { %v2220_v21 = vrot.slane %v2219_v19, 2 }
 0x68c   :  { %v2225_v63 = vadd.f32 %v2224_v53, %v2205_v12 }
 0x68d   :  { %v3186_v55 = vpop.eup %3185  ;;  %v2221_v3 = vadd.f32 %v2220_v21, %v2219_v19 }
 0x68e   :  { %v3188_v11 = vpop.eup %3187  ;;  %v2207_v47 = vmul.f32 %v3186_v55, %v4327_v32  ;;  %v2226_v10 = vadd.f32 %v2225_v63, %v2206_v2 }
 0x68f   :  { %v3190_v59 = vpop.eup %3189  ;;  %v2209_v23 = vmul.f32 %v3188_v11, %v4324_v35  ;;  %v2222_v49 = vrot.slane %v2221_v3, 1 }
 0x690   :  { %v2227_v26 = vadd.f32 %v2226_v10, %v2207_v47  ;;  %v2208_v38 = vmul.f32 %v3190_v59, %v4335_v5  ;;  %v3192_v9 = vpop.eup %3191 }
 0x691   :  { %v2210_v39 = vmul.f32 %v3192_v9, %v4331_v54  ;;  %v2223_v40 = vadd.f32 %v2222_v49, %v2221_v3  ;;  %v2574_v54 = vld [vmem:[%s4365_s4 + $0x6] ss:$0 sm:$0xff] }
 0x692   :  { %v2228_v27 = vadd.f32 %v2227_v26, %v2208_v38 }
 0x693   :  { %v2237_v8 = vmul.f32 0.015625, %v2223_v40 }
 0x694   :  { %v2229_v60 = vadd.f32 %v2228_v27, %v2209_v23 }
 0x695   :  { %v2239_v41 = vpack.c.bf16 %v2237_v8, %v2237_v8 }
 0x696   :  { %v2230_v44 = vadd.f32 %v2229_v60, %v2210_v39 }
 0x697   :  { %v2265_v45 = vunpack.c.l.b16 %v2239_v41 }
 0x698   :  { %v2231_v31 = vrot.slane %v2230_v44, 4 }
 0x69a   :  { %v2232_v30 = vadd.f32 %v2231_v31, %v2230_v44 }
 0x69c   :  { %v2233_v32 = vrot.slane %v2232_v30, 2 }
 0x69e   :  { %v2234_v4 = vadd.f32 %v2233_v32, %v2232_v30 }
 0x6a0   :  { %v2235_v1 = vrot.slane %v2234_v4, 1 }
 0x6a2   :  { %v2236_v50 = vadd.f32 %v2235_v1, %v2234_v4 }
 0x6a4   :  { %v2238_v5 = vmul.f32 0.015625, %v2236_v50 }
 0x6a6   :  { %v2240_v6 = vpack.c.bf16 %v2238_v5, %v2238_v5 }
 0x6a8   :  { %v2266_v35 = vunpack.c.l.b16 %v2240_v6 }
 0x6aa   :  { %v2267_v58 = vsel %vm1452_vm3, %v2266_v35, %v2265_v45 }
 0x6ab   :  { %v2268_v17 = vpack.c.b16 %v2267_v58, %v2267_v58 }
 0x6ad   :  { %2859 = vmatmul.mubr.bf16.vlgmr.msra.gmra.mrb[36].mxu0 %v2268_v17 }
 0x780   :  { %v2352_v22 = vpop.f32.mrb[36].mxu0 }
 0x781   :  { %v2353_v62 = vadd.f32 %v2574_v54, %v2352_v22  ;;  %v2860_v13 = vpop.f32.mrb[37].mxu0 }
 0x782   :  { %v2355_v36 = vpop.f32.mrb[38].mxu0 }
 0x783   :  { %2358 = vst [vmem:[%s4367_s5] sm:$0x3] %v2353_v62  ;;  %v2861_v15 = vpop.f32.mrb[39].mxu0 }

</bundles_post_ra>
